<compile_context>
chip_gen: v6e
topology: v6e:2x2x1
jax: 0.10.0
libtpu: 0.0.40
codegen_flags: <defaults>
</compile_context>

<pallas_src>
import jax
import jax.numpy as jnp
from jax.experimental import pallas as pl
from jax.experimental.pallas import tpu as pltpu

_LN10 = 2.302585092994046

# "untried" -> attempt in-kernel PRNG; "ok" -> use it; "unavailable" -> fallback.
_PRNG_PATH = "untried"


def _sigma_from_power(x_f32, snr_db):
    """Per-row noise std-dev: sigma = sqrt(10^((sig_db - snr)/10) / 2)."""
    n_samples = x_f32.shape[-1] // 2                      # N (static)
    # mean_n(real^2 + imag^2) == sum over all 2N squared entries / N
    sig_power = jnp.sum(x_f32 * x_f32, axis=-1, keepdims=True) * (1.0 / n_samples)
    sig_db = (10.0 / _LN10) * jnp.log(sig_power)          # 10 * log10(P)
    noise_db = sig_db - snr_db                            # (TB, 1)
    return jnp.sqrt(jnp.exp(noise_db * (_LN10 / 10.0)) * 0.5)


def _awgn_prng_kernel(seed_ref, x_ref, snr_ref, o_ref):
    # seed_ref: (1,) int32 in SMEM (scalar prefetch).
    # x_ref / o_ref view: (TB, 2N); snr_ref view: (TB, 1) float32.
    pltpu.prng_seed(seed_ref[0], pl.program_id(0))
    x = x_ref[...].astype(jnp.float32)
    sigma = _sigma_from_power(x, snr_ref[...])
    noise = pltpu.stateful_normal(x.shape, jnp.float32)
    o_ref[...] = (x + sigma * noise).astype(o_ref.dtype)


def _awgn_stream_kernel(x_ref, noise_ref, snr_ref, o_ref):
    # Fallback path: noise generated by jax.random in the wrapper.
    x = x_ref[...].astype(jnp.float32)
    sigma = _sigma_from_power(x, snr_ref[...])
    o_ref[...] = (x + sigma * noise_ref[...].astype(jnp.float32)).astype(o_ref.dtype)


def _pick_block_rows(batch, lanes):
    """Batch rows per grid step: divisor of `batch`, ~512 KiB per input block,
    and sublane-friendly (multiple of 8) unless it spans the whole batch."""
    target = max(1, (512 * 1024) // (lanes * 4))
    if batch <= target:
        return batch
    for cand in range(target, 0, -1):
        if batch % cand == 0 and cand % 8 == 0:
            return cand
    return batch  # fallback: single block covering the full batch


def _call_prng(x2, snr, seed, tb, lanes, out_dtype):
    B = x2.shape[0]
    cost = pl.CostEstimate(
        flops=4 * B * lanes,
        transcendentals=2 * B + B * lanes,           # log/exp + on-chip normals
        bytes_accessed=2 * B * lanes * 4 + 2 * B * 4,  # x in, out, snr, seed
    )
    return pl.pallas_call(
        _awgn_prng_kernel,
        out_shape=jax.ShapeDtypeStruct((B, lanes), out_dtype),
        grid_spec=pltpu.PrefetchScalarGridSpec(
            num_scalar_prefetch=1,
            grid=(B // tb,),
            in_specs=[
                pl.BlockSpec((tb, lanes), lambda i, seed_ref: (i, 0)),  # x block
                pl.BlockSpec((tb, 1), lambda i, seed_ref: (i, 0)),      # SNR col
            ],
            out_specs=pl.BlockSpec((tb, lanes), lambda i, seed_ref: (i, 0)),
        ),
        compiler_params=pltpu.CompilerParams(
            dimension_semantics=("arbitrary",)),
        cost_estimate=cost,
    )(seed, x2, snr)


def _call_stream(x2, noise, snr, tb, lanes, out_dtype):
    B = x2.shape[0]
    cost = pl.CostEstimate(
        flops=3 * B * lanes,
        transcendentals=2 * B,
        bytes_accessed=3 * B * lanes * 4 + B * 4,
    )
    return pl.pallas_call(
        _awgn_stream_kernel,
        out_shape=jax.ShapeDtypeStruct((B, lanes), out_dtype),
        grid=(B // tb,),
        in_specs=[
            pl.BlockSpec((tb, lanes), lambda i: (i, 0)),   # x block
            pl.BlockSpec((tb, lanes), lambda i: (i, 0)),   # noise block
            pl.BlockSpec((tb, 1), lambda i: (i, 0)),       # per-batch SNR
        ],
        out_specs=pl.BlockSpec((tb, lanes), lambda i: (i, 0)),
        compiler_params=pltpu.CompilerParams(
            dimension_semantics=("parallel",)),
        cost_estimate=cost,
    )(x2, noise, snr)


def awgn(x, snr_min, snr_max, key):
    """Pallas AWGN channel.  Pass-through if snr_min or snr_max is None."""
    global _PRNG_PATH
    if snr_min is None or snr_max is None:
        return x

    B, C, two, N = x.shape
    assert C == 1 and two == 2, "expected x of shape (B, 1, 2, N)"
    lanes = 2 * N

    k_snr, k_noise = jax.random.split(key)
    # torch.randint(low, high) draws integers in [low, high)
    snr = jax.random.randint(k_snr, (B, 1), int(snr_min), int(snr_max),
                             dtype=jnp.int32).astype(jnp.float32)

    x2 = x.reshape(B, lanes)          # contiguous reshape: lane-dense rows
    tb = _pick_block_rows(B, lanes)

    if _PRNG_PATH != "unavailable":
        # 32-bit seed for the in-kernel hardware PRNG, derived from the JAX key.
        seed = jax.random.randint(k_noise, (1,), 0, jnp.iinfo(jnp.int32).max,
                                  dtype=jnp.int32)
        try:
            out2 = _call_prng(x2, snr, seed, tb, lanes, x.dtype)
            if _PRNG_PATH == "untried":
                out2 = jax.block_until_ready(out2)   # validate path once
                _PRNG_PATH = "ok"
            return out2.reshape(B, C, two, N)
        except Exception:
            # In-kernel PRNG not supported by this jax/libtpu: use proven path.
            _PRNG_PATH = "unavailable"

    noise = jax.random.normal(k_noise, (B, lanes), dtype=jnp.float32)
    out2 = _call_stream(x2, noise, snr, tb, lanes, x.dtype)
    return out2.reshape(B, C, two, N)


if __name__ == "__main__":
    B, N = 8, 512
    key = jax.random.PRNGKey(0)
    k_x, k_chan = jax.random.split(key)

    x = jax.random.normal(k_x, (B, 1, 2, N), dtype=jnp.float32)

    # Pass-through case (snr == None), mirrors the PyTorch module.
    y_pass = awgn(x, None, None, k_chan)
    assert (y_pass == x).all()

    # Noisy case.
    out = awgn(x, 5, 15, k_chan)
    out = jax.block_until_ready(out)

    assert out.shape == x.shape and out.dtype == x.dtype
    assert bool(jnp.isfinite(out).all())
    # Noise was actually added.
    assert float(jnp.max(jnp.abs(out - x))) > 0.0

    # Reference check.  Noise is regenerated on-chip, so the check is
    # distributional: per-batch noise std must match the analytic
    # sigma_b = sqrt(10^((sig_db - snr_b)/10) / 2) and be zero-mean
    # (2N = 1024 samples per batch row => std error ~2%, thresholds are >6 sigma).
    k_snr, _ = jax.random.split(k_chan)
    snr_ref = jax.random.randint(k_snr, (B, 1), 5, 15,
                                 dtype=jnp.int32).astype(jnp.float32)
    x2 = x.reshape(B, 2 * N)
    sig_power = jnp.mean(x2 * x2, axis=-1, keepdims=True) * 2.0   # mean(re^2+im^2)
    sig_db = 10.0 * jnp.log10(sig_power)
    sigma_ref = jnp.sqrt(10.0 ** ((sig_db - snr_ref) / 10.0) / 2.0)  # (B, 1)

    noise_realized = (out - x).reshape(B, 2 * N)
    noise_std = jnp.std(noise_realized, axis=-1, keepdims=True)
    assert float(jnp.max(jnp.abs(noise_std / sigma_ref - 1.0))) < 0.15
    assert float(jnp.max(jnp.abs(jnp.mean(noise_realized / sigma_ref, axis=-1)))) < 0.2

    print("KERNEL_OK")
</pallas_src>

<mosaic_0001>
module attributes {stable_mosaic.version = 11 : i64} {
  func.func @_awgn_prng_kernel(%arg0: i32, %arg1: memref<1xi32, #tpu.memory_space<smem>>, %arg2: memref<8x1024xf32, #tpu.memory_space<vmem>>, %arg3: memref<8x1xf32, #tpu.memory_space<vmem>>, %arg4: memref<8x1024xf32, #tpu.memory_space<vmem>>) attributes {dimension_semantics = [#tpu.dimension_semantics<arbitrary>], iteration_bounds = array<i64: 1>, scalar_prefetch = 1 : i64, scratch_operands = 0 : i64, tpu.core_type = #tpu.core_type<tc>, window_params = [{transform_indices = @transform_0, window_bounds = array<i64: 8, 1024>}, {transform_indices = @transform_1, window_bounds = array<i64: 8, 1>}, {transform_indices = @transform_2, window_bounds = array<i64: 8, 1024>}]} {
    %c0 = arith.constant 0 : index
    %0 = memref.load %arg1[%c0] : memref<1xi32, #tpu.memory_space<smem>>
    "tpu.prng_set_seed_32"(%0, %arg0) : (i32, i32) -> ()
    %c0_0 = arith.constant 0 : index
    %c0_1 = arith.constant 0 : index
    %1 = vector.load %arg2[%c0_0, %c0_1] : memref<8x1024xf32, #tpu.memory_space<vmem>>, vector<8x1024xf32>
    %c0_2 = arith.constant 0 : index
    %c0_3 = arith.constant 0 : index
    %2 = vector.load %arg3[%c0_2, %c0_3] : memref<8x1xf32, #tpu.memory_space<vmem>>, vector<8x1xf32>
    %3 = arith.mulf %1, %1 : vector<8x1024xf32>
    %cst = arith.constant dense<0.000000e+00> : vector<8xf32>
    %4 = vector.multi_reduction <add>, %3, %cst [1] : vector<8x1024xf32> to vector<8xf32>
    %5 = vector.shape_cast %4 : vector<8xf32> to vector<8x1xf32>
    %cst_4 = arith.constant 0.001953125 : f32
    %6 = vector.broadcast %cst_4 : f32 to vector<8x1xf32>
    %7 = arith.mulf %5, %6 : vector<8x1xf32>
    %8 = math.log %7 : vector<8x1xf32>
    %cst_5 = arith.constant 4.34294462 : f32
    %9 = vector.broadcast %cst_5 : f32 to vector<8x1xf32>
    %10 = arith.mulf %9, %8 : vector<8x1xf32>
    %11 = arith.subf %10, %2 : vector<8x1xf32>
    %cst_6 = arith.constant 0.23025851 : f32
    %12 = vector.broadcast %cst_6 : f32 to vector<8x1xf32>
    %13 = arith.mulf %11, %12 : vector<8x1xf32>
    %14 = math.exp %13 : vector<8x1xf32>
    %cst_7 = arith.constant 5.000000e-01 : f32
    %15 = vector.broadcast %cst_7 : f32 to vector<8x1xf32>
    %16 = arith.mulf %14, %15 : vector<8x1xf32>
    %17 = math.sqrt %16 : vector<8x1xf32>
    %c0_i32 = arith.constant 0 : i32
    %c0_i32_8 = arith.constant 0 : i32
    %cst_9 = arith.constant -0.99999994 : f32
    %cst_10 = arith.constant 1.000000e+00 : f32
    %18 = vector.broadcast %cst_9 : f32 to vector<1x1xf32>
    %19 = vector.broadcast %cst_10 : f32 to vector<1x1xf32>
    %20 = "tpu.prng_random_bits"() : () -> vector<8x1024xi32>
    %c9_i32 = arith.constant 9 : i32
    %21 = vector.broadcast %c9_i32 : i32 to vector<8x1024xi32>
    %22 = arith.shrui %20, %21 : vector<8x1024xi32>
    %c1065353216_i32 = arith.constant 1065353216 : i32
    %23 = vector.broadcast %c1065353216_i32 : i32 to vector<8x1024xi32>
    %24 = arith.ori %22, %23 : vector<8x1024xi32>
    %25 = tpu.bitcast %24 : vector<8x1024xi32> -> vector<8x1024xf32>
    %cst_11 = arith.constant 1.000000e+00 : f32
    %26 = vector.broadcast %cst_11 : f32 to vector<8x1024xf32>
    %27 = arith.subf %25, %26 : vector<8x1024xf32>
    %28 = arith.subf %19, %18 : vector<1x1xf32>
    %29 = vector.broadcast %28 : vector<1x1xf32> to vector<8x1024xf32>
    %30 = arith.mulf %27, %29 : vector<8x1024xf32>
    %31 = vector.broadcast %18 : vector<1x1xf32> to vector<8x1024xf32>
    %32 = arith.addf %30, %31 : vector<8x1024xf32>
    %33 = vector.broadcast %18 : vector<1x1xf32> to vector<8x1024xf32>
    %34 = arith.maximumf %33, %32 : vector<8x1024xf32>
    %cst_12 = arith.constant 0.000000e+00 : f32
    %35 = vector.broadcast %cst_12 : f32 to vector<8x1024xf32>
    %36 = arith.subf %35, %34 : vector<8x1024xf32>
    %37 = arith.mulf %34, %36 : vector<8x1024xf32>
    %38 = math.log1p %37 : vector<8x1024xf32>
    %cst_13 = arith.constant 0.000000e+00 : f32
    %39 = vector.broadcast %cst_13 : f32 to vector<8x1024xf32>
    %40 = arith.subf %39, %38 : vector<8x1024xf32>
    %cst_14 = arith.constant 5.000000e+00 : f32
    %41 = vector.broadcast %cst_14 : f32 to vector<8x1024xf32>
    %42 = arith.cmpf olt, %40, %41 : vector<8x1024xf32>
    %cst_15 = arith.constant 2.500000e+00 : f32
    %43 = vector.broadcast %cst_15 : f32 to vector<8x1024xf32>
    %44 = arith.subf %40, %43 : vector<8x1024xf32>
    %45 = math.sqrt %40 : vector<8x1024xf32>
    %cst_16 = arith.constant 3.000000e+00 : f32
    %46 = vector.broadcast %cst_16 : f32 to vector<8x1024xf32>
    %47 = arith.subf %45, %46 : vector<8x1024xf32>
    %48 = arith.select %42, %44, %47 : vector<8x1024xi1>, vector<8x1024xf32>
    %cst_17 = arith.constant 2.81022636E-8 : f32
    %cst_18 = arith.constant -2.00214257E-4 : f32
    %49 = vector.broadcast %cst_17 : f32 to vector<8x1024xf32>
    %50 = vector.broadcast %cst_18 : f32 to vector<8x1024xf32>
    %51 = arith.select %42, %49, %50 : vector<8x1024xi1>, vector<8x1024xf32>
    %cst_19 = arith.constant 3.43273939E-7 : f32
    %cst_20 = arith.constant 1.00950558E-4 : f32
    %52 = vector.broadcast %cst_19 : f32 to vector<8x1024xf32>
    %53 = vector.broadcast %cst_20 : f32 to vector<8x1024xf32>
    %54 = arith.select %42, %52, %53 : vector<8x1024xi1>, vector<8x1024xf32>
    %55 = arith.mulf %51, %48 : vector<8x1024xf32>
    %56 = arith.addf %54, %55 : vector<8x1024xf32>
    %cst_21 = arith.constant -3.5233877E-6 : f32
    %cst_22 = arith.constant 0.00134934322 : f32
    %57 = vector.broadcast %cst_21 : f32 to vector<8x1024xf32>
    %58 = vector.broadcast %cst_22 : f32 to vector<8x1024xf32>
    %59 = arith.select %42, %57, %58 : vector<8x1024xi1>, vector<8x1024xf32>
    %60 = arith.mulf %56, %48 : vector<8x1024xf32>
    %61 = arith.addf %59, %60 : vector<8x1024xf32>
    %cst_23 = arith.constant -4.39150654E-6 : f32
    %cst_24 = arith.constant -0.00367342844 : f32
    %62 = vector.broadcast %cst_23 : f32 to vector<8x1024xf32>
    %63 = vector.broadcast %cst_24 : f32 to vector<8x1024xf32>
    %64 = arith.select %42, %62, %63 : vector<8x1024xi1>, vector<8x1024xf32>
    %65 = arith.mulf %61, %48 : vector<8x1024xf32>
    %66 = arith.addf %64, %65 : vector<8x1024xf32>
    %cst_25 = arith.constant 2.1858087E-4 : f32
    %cst_26 = arith.constant 0.00573950773 : f32
    %67 = vector.broadcast %cst_25 : f32 to vector<8x1024xf32>
    %68 = vector.broadcast %cst_26 : f32 to vector<8x1024xf32>
    %69 = arith.select %42, %67, %68 : vector<8x1024xi1>, vector<8x1024xf32>
    %70 = arith.mulf %66, %48 : vector<8x1024xf32>
    %71 = arith.addf %69, %70 : vector<8x1024xf32>
    %cst_27 = arith.constant -0.00125372503 : f32
    %cst_28 = arith.constant -0.0076224613 : f32
    %72 = vector.broadcast %cst_27 : f32 to vector<8x1024xf32>
    %73 = vector.broadcast %cst_28 : f32 to vector<8x1024xf32>
    %74 = arith.select %42, %72, %73 : vector<8x1024xi1>, vector<8x1024xf32>
    %75 = arith.mulf %71, %48 : vector<8x1024xf32>
    %76 = arith.addf %74, %75 : vector<8x1024xf32>
    %cst_29 = arith.constant -0.00417768164 : f32
    %cst_30 = arith.constant 0.00943887047 : f32
    %77 = vector.broadcast %cst_29 : f32 to vector<8x1024xf32>
    %78 = vector.broadcast %cst_30 : f32 to vector<8x1024xf32>
    %79 = arith.select %42, %77, %78 : vector<8x1024xi1>, vector<8x1024xf32>
    %80 = arith.mulf %76, %48 : vector<8x1024xf32>
    %81 = arith.addf %79, %80 : vector<8x1024xf32>
    %cst_31 = arith.constant 0.246640727 : f32
    %cst_32 = arith.constant 1.00167406 : f32
    %82 = vector.broadcast %cst_31 : f32 to vector<8x1024xf32>
    %83 = vector.broadcast %cst_32 : f32 to vector<8x1024xf32>
    %84 = arith.select %42, %82, %83 : vector<8x1024xi1>, vector<8x1024xf32>
    %85 = arith.mulf %81, %48 : vector<8x1024xf32>
    %86 = arith.addf %84, %85 : vector<8x1024xf32>
    %cst_33 = arith.constant 1.50140941 : f32
    %cst_34 = arith.constant 2.83297682 : f32
    %87 = vector.broadcast %cst_33 : f32 to vector<8x1024xf32>
    %88 = vector.broadcast %cst_34 : f32 to vector<8x1024xf32>
    %89 = arith.select %42, %87, %88 : vector<8x1024xi1>, vector<8x1024xf32>
    %90 = arith.mulf %86, %48 : vector<8x1024xf32>
    %91 = arith.addf %89, %90 : vector<8x1024xf32>
    %92 = math.absf %34 : vector<8x1024xf32>
    %cst_35 = arith.constant 1.000000e+00 : f32
    %93 = vector.broadcast %cst_35 : f32 to vector<8x1024xf32>
    %94 = arith.cmpf oeq, %92, %93 : vector<8x1024xf32>
    %cst_36 = arith.constant 0x7F800000 : f32
    %95 = vector.broadcast %cst_36 : f32 to vector<8x1024xf32>
    %96 = arith.mulf %95, %34 : vector<8x1024xf32>
    %97 = arith.mulf %91, %34 : vector<8x1024xf32>
    %98 = arith.select %94, %96, %97 : vector<8x1024xi1>, vector<8x1024xf32>
    %cst_37 = arith.constant 1.41421354 : f32
    %99 = vector.broadcast %cst_37 : f32 to vector<8x1024xf32>
    %100 = arith.mulf %99, %98 : vector<8x1024xf32>
    %101 = vector.broadcast %17 : vector<8x1xf32> to vector<8x1024xf32>
    %102 = arith.mulf %101, %100 : vector<8x1024xf32>
    %103 = arith.addf %1, %102 : vector<8x1024xf32>
    %c0_38 = arith.constant 0 : index
    %c0_39 = arith.constant 0 : index
    %104 = vector.load %arg4[%c0_38, %c0_39] : memref<8x1024xf32, #tpu.memory_space<vmem>>, vector<8x1024xf32>
    tpu.vector_store %arg4[%c0_38, %c0_39], %103 {strides = array<i32>} : memref<8x1024xf32, #tpu.memory_space<vmem>>, vector<8x1024xf32>,
    return
  }
  func.func @transform_0(%arg0: i32, %arg1: memref<1xi32, #tpu.memory_space<smem>>) -> (i32, i32) {
    %c0_i32 = arith.constant 0 : i32
    %c0_i32_0 = arith.constant 0 : i32
    return %arg0, %c0_i32 : i32, i32
  }
  func.func @transform_1(%arg0: i32, %arg1: memref<1xi32, #tpu.memory_space<smem>>) -> (i32, i32) {
    %c0_i32 = arith.constant 0 : i32
    %c0_i32_0 = arith.constant 0 : i32
    return %arg0, %c0_i32 : i32, i32
  }
  func.func @transform_2(%arg0: i32, %arg1: memref<1xi32, #tpu.memory_space<smem>>) -> (i32, i32) {
    %c0_i32 = arith.constant 0 : i32
    %c0_i32_0 = arith.constant 0 : i32
    return %arg0, %c0_i32 : i32, i32
  }
}

module attributes {stable_mosaic.version = 11 : i64} {
  func.func @_awgn_stream_kernel(%arg0: i32, %arg1: memref<8x1024xf32, #tpu.memory_space<vmem>>, %arg2: memref<8x1024xf32, #tpu.memory_space<vmem>>, %arg3: memref<8x1xf32, #tpu.memory_space<vmem>>, %arg4: memref<8x1024xf32, #tpu.memory_space<vmem>>) attributes {dimension_semantics = [#tpu.dimension_semantics<parallel>], iteration_bounds = array<i64: 1>, scalar_prefetch = 0 : i64, scratch_operands = 0 : i64, tpu.core_type = #tpu.core_type<tc>, window_params = [{transform_indices = @transform_0, window_bounds = array<i64: 8, 1024>}, {transform_indices = @transform_1, window_bounds = array<i64: 8, 1024>}, {transform_indices = @transform_2, window_bounds = array<i64: 8, 1>}, {transform_indices = @transform_3, window_bounds = array<i64: 8, 1024>}]} {
    %c0 = arith.constant 0 : index
    %c0_0 = arith.constant 0 : index
    %0 = vector.load %arg1[%c0, %c0_0] : memref<8x1024xf32, #tpu.memory_space<vmem>>, vector<8x1024xf32>
    %c0_1 = arith.constant 0 : index
    %c0_2 = arith.constant 0 : index
    %1 = vector.load %arg3[%c0_1, %c0_2] : memref<8x1xf32, #tpu.memory_space<vmem>>, vector<8x1xf32>
    %2 = arith.mulf %0, %0 : vector<8x1024xf32>
    %cst = arith.constant dense<0.000000e+00> : vector<8xf32>
    %3 = vector.multi_reduction <add>, %2, %cst [1] : vector<8x1024xf32> to vector<8xf32>
    %4 = vector.shape_cast %3 : vector<8xf32> to vector<8x1xf32>
    %cst_3 = arith.constant 0.001953125 : f32
    %5 = vector.broadcast %cst_3 : f32 to vector<8x1xf32>
    %6 = arith.mulf %4, %5 : vector<8x1xf32>
    %7 = math.log %6 : vector<8x1xf32>
    %cst_4 = arith.constant 4.34294462 : f32
    %8 = vector.broadcast %cst_4 : f32 to vector<8x1xf32>
    %9 = arith.mulf %8, %7 : vector<8x1xf32>
    %10 = arith.subf %9, %1 : vector<8x1xf32>
    %cst_5 = arith.constant 0.23025851 : f32
    %11 = vector.broadcast %cst_5 : f32 to vector<8x1xf32>
    %12 = arith.mulf %10, %11 : vector<8x1xf32>
    %13 = math.exp %12 : vector<8x1xf32>
    %cst_6 = arith.constant 5.000000e-01 : f32
    %14 = vector.broadcast %cst_6 : f32 to vector<8x1xf32>
    %15 = arith.mulf %13, %14 : vector<8x1xf32>
    %16 = math.sqrt %15 : vector<8x1xf32>
    %c0_7 = arith.constant 0 : index
    %c0_8 = arith.constant 0 : index
    %17 = vector.load %arg2[%c0_7, %c0_8] : memref<8x1024xf32, #tpu.memory_space<vmem>>, vector<8x1024xf32>
    %18 = vector.broadcast %16 : vector<8x1xf32> to vector<8x1024xf32>
    %19 = arith.mulf %18, %17 : vector<8x1024xf32>
    %20 = arith.addf %0, %19 : vector<8x1024xf32>
    %c0_9 = arith.constant 0 : index
    %c0_10 = arith.constant 0 : index
    %21 = vector.load %arg4[%c0_9, %c0_10] : memref<8x1024xf32, #tpu.memory_space<vmem>>, vector<8x1024xf32>
    tpu.vector_store %arg4[%c0_9, %c0_10], %20 {strides = array<i32>} : memref<8x1024xf32, #tpu.memory_space<vmem>>, vector<8x1024xf32>,
    return
  }
  func.func @transform_0(%arg0: i32) -> (i32, i32) {
    %c0_i32 = arith.constant 0 : i32
    %c0_i32_0 = arith.constant 0 : i32
    return %arg0, %c0_i32 : i32, i32
  }
  func.func @transform_1(%arg0: i32) -> (i32, i32) {
    %c0_i32 = arith.constant 0 : i32
    %c0_i32_0 = arith.constant 0 : i32
    return %arg0, %c0_i32 : i32, i32
  }
  func.func @transform_2(%arg0: i32) -> (i32, i32) {
    %c0_i32 = arith.constant 0 : i32
    %c0_i32_0 = arith.constant 0 : i32
    return %arg0, %c0_i32 : i32, i32
  }
  func.func @transform_3(%arg0: i32) -> (i32, i32) {
    %c0_i32 = arith.constant 0 : i32
    %c0_i32_0 = arith.constant 0 : i32
    return %arg0, %c0_i32 : i32, i32
  }
}

</mosaic_0001>

<bundles_post_ra>
// kernel: tpu_custom_call.1
= control target key start
LH: loop header
LB: loop body
LE: loop exit
PB: predicated region body
PF: predicated region fallthrough
CT: control target
= control target key end

     0   :  { %9 = vsyncpa [#allocation5], 0  ;;  %s1475_s0 = inlined_call_operand.<no memory space> [shape: s32[1], index: 0, kind: input, shape index: {}]   ;;  %s1476_s1 = inlined_call_operand.hbm [shape: f32[8,1024], index: 1, kind: input, shape index: {}]   ;;  %s1477_s2 = inlined_call_operand.vmem [shape: f32[8,1], index: 2, kind: input, shape index: {}]   ;;  %s1478_s3 = inlined_call_operand.hbm [shape: f32[8,1024], index: 3, kind: output, shape index: {}]  }
   0x1   :  { %10 = vsyncpa [#allocation6], 0  ;;  %s860_s12 = smov [#allocation4]  }
   0x2   :  { %s17_s13 = sshll.u32 %s860_s12, 4  ;;  %s18_s13 = int_to_ptr.vmem [resolvable:$true] %s17_s13 }
   0x3   :  { %s824_s14 = scalar_lea.vmem %s18_s13, 1024  ;;  %p829_p1 = scmp.lt.s32.totalorder %s18_s13, %s18_s13 }
   0x4   :  { %p825_p0 = scmp.ne.s32.totalorder %s18_s13, %s824_s14  ;;  %p830_p2 = scmp.lt.s32.totalorder %s824_s14, %s824_s14 }
   0x6   :  { %p831_p3 = por %p830_p2, %p829_p1 }
   0x8   :  { %p832_p4 = pnand %p831_p3, %p825_p0 }
   0xa   :  { %835 = shalt.err (!%p832_p4)
}
   0xb   :  { %20 = dma.hbm_to_vmem [thread:$0]  %s1476_s1, 1024, %s18_s13, [#allocation5]  }
   0xc   :  { %856 = dma.done.wait [#allocation5], 1024  }
   0xd   :  { %857 = vsyncadd [#allocation5], 4294966272  ;;  %v27_v0 = vlaneseq  ;;  %v898_v1 = vstv %s1475_s0  ;;  %v151_v7 = vld [vmem:[#allocation4] sm:$0xff]  ;;  %v152_v8 = vld [vmem:[#allocation4 + $0x8] sm:$0xff] }
   0xe   :  { %v153_v9 = vld [vmem:[#allocation4 + $0x10] sm:$0xff]  ;;  %v154_v10 = vld [vmem:[#allocation4 + $0x18] sm:$0xff]  ;;  %v160_v11 = vmul.f32 %v151_v7, %v151_v7  ;;  %v161_v12 = vmul.f32 %v152_v8, %v152_v8  ;;  %v155_v15 = vld [vmem:[#allocation4 + $0x20] sm:$0xff]  ;;  %v902_v44 = vxor.u32 466688986, %v898_v1 }
   0xf   :  { %v33_v2 = vadd.s32 %v898_v1, %v27_v0  ;;  %v162_v13 = vmul.f32 %v153_v9, %v153_v9  ;;  %v163_v16 = vmul.f32 %v154_v10, %v154_v10  ;;  %v156_v18 = vld [vmem:[#allocation4 + $0x28] sm:$0xff]  ;;  %v164_v22 = vmul.f32 %v155_v15, %v155_v15  ;;  %v157_v24 = vld [vmem:[#allocation4 + $0x30] sm:$0xff]  ;;  %v158_v28 = vld [vmem:[#allocation4 + $0x38] sm:$0xff] }
  0x10   :  { %v168_v17 = vadd.f32 %v161_v12, %v160_v11  ;;  %v165_v26 = vmul.f32 %v156_v18, %v156_v18  ;;  %v166_v30 = vmul.f32 %v157_v24, %v157_v24  ;;  %v167_v35 = vmul.f32 %v158_v28, %v158_v28 }
  0x11   :  { %v34_v3 = vadd.s32 %v33_v2, %v27_v0  ;;  %v35_v4 = vshll.u32 %v33_v2, 13  ;;  %v36_v5 = vshrl.u32 %v33_v2, 19 }
  0x12   :  { %v169_v23 = vadd.f32 %v168_v17, %v162_v13 }
  0x13   :  { %v37_v6 = vor.u32 %v36_v5, %v35_v4 }
  0x14   :  { %v170_v27 = vadd.f32 %v169_v23, %v163_v16 }
  0x15   :  { %v38_v14 = vxor.u32 %v37_v6, %v34_v3 }
  0x16   :  { %v171_v31 = vadd.f32 %v170_v27, %v164_v22 }
  0x17   :  { %v39_v19 = vadd.s32 %v38_v14, %v34_v3  ;;  %v40_v20 = vshll.u32 %v38_v14, 15  ;;  %v41_v21 = vshrl.u32 %v38_v14, 17 }
  0x18   :  { %v172_v36 = vadd.f32 %v171_v31, %v165_v26 }
  0x19   :  { %v42_v25 = vor.u32 %v41_v21, %v40_v20 }
  0x1a   :  { %v173_v38 = vadd.f32 %v172_v36, %v166_v30 }
  0x1b   :  { %v43_v29 = vxor.u32 %v42_v25, %v39_v19 }
  0x1c   :  { %v174_v40 = vadd.f32 %v173_v38, %v167_v35 }
  0x1d   :  { %v44_v32 = vadd.s32 %v43_v29, %v39_v19  ;;  %v45_v33 = vshll.u32 %v43_v29, 26  ;;  %v46_v34 = vshrl.u32 %v43_v29, 6 }
  0x1e   :  { %175 = vadd.xlane.f32.xlu0 %v174_v40 }
  0x1f   :  { %v47_v37 = vor.u32 %v46_v34, %v45_v33 }
  0x21   :  { %v48_v39 = vxor.u32 %v47_v37, %v44_v32 }
  0x23   :  { %v49_v41 = vadd.s32 %v48_v39, %v44_v32  ;;  %v50_v42 = vshll.u32 %v48_v39, 6  ;;  %v51_v43 = vshrl.u32 %v48_v39, 26 }
  0x25   :  { %v52_v45 = vor.u32 %v51_v43, %v50_v42  ;;  %v54_v47 = vadd.s32 %v49_v41, %v898_v1 }
  0x27   :  { %v53_v46 = vxor.u32 %v52_v45, %v49_v41 }
  0x29   :  { %v55_v48 = vadd.s32 %v53_v46, %v902_v44 }
  0x2b   :  { %v56_v49 = vadd.s32 1, %v55_v48 }
  0x2d   :  { %v57_v50 = vadd.s32 %v56_v49, %v54_v47  ;;  %v58_v51 = vshll.u32 %v56_v49, 17  ;;  %v59_v52 = vshrl.u32 %v56_v49, 15 }
  0x2f   :  { %v60_v53 = vor.u32 %v59_v52, %v58_v51 }
  0x31   :  { %v61_v54 = vxor.u32 %v60_v53, %v57_v50 }
  0x33   :  { %v62_v55 = vadd.s32 %v61_v54, %v57_v50  ;;  %v63_v56 = vshll.u32 %v61_v54, 29  ;;  %v64_v57 = vshrl.u32 %v61_v54, 3 }
  0x35   :  { %v65_v58 = vor.u32 %v64_v57, %v63_v56 }
  0x37   :  { %v66_v59 = vxor.u32 %v65_v58, %v62_v55 }
  0x39   :  { %v67_v60 = vadd.s32 %v66_v59, %v62_v55  ;;  %v68_v61 = vshll.u32 %v66_v59, 16  ;;  %v69_v62 = vshrl.u32 %v66_v59, 16 }
  0x3b   :  { %v70_v63 = vor.u32 %v69_v62, %v68_v61 }
  0x3d   :  { %v71_v0 = vxor.u32 %v70_v63, %v67_v60 }
  0x3f   :  { %v72_v2 = vadd.s32 %v71_v0, %v67_v60  ;;  %v73_v3 = vshll.u32 %v71_v0, 24  ;;  %v74_v4 = vshrl.u32 %v71_v0, 8 }
  0x41   :  { %v75_v5 = vor.u32 %v74_v4, %v73_v3  ;;  %v77_v7 = vadd.s32 %v72_v2, %v902_v44 }
  0x43   :  { %v76_v6 = vxor.u32 %v75_v5, %v72_v2 }
  0x45   :  { %v79_v8 = vadd.s32 2, %v76_v6 }
  0x47   :  { %v80_v9 = vadd.s32 %v79_v8, %v77_v7  ;;  %v81_v10 = vshll.u32 %v79_v8, 13  ;;  %v82_v11 = vshrl.u32 %v79_v8, 19 }
  0x49   :  { %v83_v12 = vor.u32 %v82_v11, %v81_v10 }
  0x4b   :  { %v84_v13 = vxor.u32 %v83_v12, %v80_v9 }
  0x4d   :  { %v85_v14 = vadd.s32 %v84_v13, %v80_v9  ;;  %v86_v15 = vshll.u32 %v84_v13, 15  ;;  %v87_v16 = vshrl.u32 %v84_v13, 17 }
  0x4f   :  { %v88_v17 = vor.u32 %v87_v16, %v86_v15 }
  0x51   :  { %v89_v18 = vxor.u32 %v88_v17, %v85_v14 }
  0x53   :  { %v90_v19 = vadd.s32 %v89_v18, %v85_v14  ;;  %v91_v20 = vshll.u32 %v89_v18, 26  ;;  %v92_v21 = vshrl.u32 %v89_v18, 6  ;;  %v861_v14 = vmov 0  }
  0x54   :  { %769 = vset.pattern.permute.xlu0 %v861_v14 }
  0x55   :  { %v93_v22 = vor.u32 %v92_v21, %v91_v20 }
  0x57   :  { %v94_v23 = vxor.u32 %v93_v22, %v90_v19 }
  0x59   :  { %v95_v24 = vadd.s32 %v94_v23, %v90_v19  ;;  %v96_v25 = vshll.u32 %v94_v23, 6  ;;  %v97_v26 = vshrl.u32 %v94_v23, 26 }
  0x5b   :  { %v98_v27 = vor.u32 %v97_v26, %v96_v25 }
  0x5d   :  { %v99_v28 = vxor.u32 %v98_v27, %v95_v24 }
  0x5f   :  { %v101_v29 = vadd.s32 %v99_v28, %v898_v1 }
  0x61   :  { %v102_v30 = vadd.s32 3, %v101_v29 }
  0x63   :  { %v103_v31 = vadd.s32 %v102_v30, %v95_v24  ;;  %v104_v32 = vshll.u32 %v102_v30, 17  ;;  %v105_v33 = vshrl.u32 %v102_v30, 15  ;;  %v159_v24 = vld [vmem:[%s1477_s2] sm:$0xff]  ;;  %s871_s2 = smov [#allocation7]  }
  0x64   :  { %s724_s19 = sshll.u32 %s871_s2, 4  ;;  %s725_s19 = int_to_ptr.vmem [resolvable:$true] %s724_s19 }
  0x65   :  { %v106_v34 = vor.u32 %v105_v33, %v104_v32  ;;  %s836_s20 = scalar_lea.vmem %s725_s19, 1024  ;;  %p841_p6 = scmp.lt.s32.totalorder %s725_s19, %s725_s19 }
  0x66   :  { %p837_p5 = scmp.ne.s32.totalorder %s725_s19, %s836_s20  ;;  %p842_p7 = scmp.lt.s32.totalorder %s836_s20, %s836_s20 }
  0x67   :  { %v107_v35 = vxor.u32 %v106_v34, %v103_v31 }
  0x68   :  { %p843_p8 = por %p842_p7, %p841_p6 }
  0x69   :  { %v108_v36 = vadd.s32 %v107_v35, %v103_v31  ;;  %v109_v37 = vshll.u32 %v107_v35, 29  ;;  %v110_v38 = vshrl.u32 %v107_v35, 3 }
  0x6a   :  { %p844_p9 = pnand %p843_p8, %p837_p5 }
  0x6b   :  { %v111_v39 = vor.u32 %v110_v38, %v109_v37 }
  0x6d   :  { %v112_v40 = vxor.u32 %v111_v39, %v108_v36 }
  0x6f   :  { %v113_v41 = vadd.s32 %v112_v40, %v108_v36  ;;  %v114_v42 = vshll.u32 %v112_v40, 16  ;;  %v115_v43 = vshrl.u32 %v112_v40, 16 }
  0x71   :  { %v116_v45 = vor.u32 %v115_v43, %v114_v42 }
  0x73   :  { %v117_v46 = vxor.u32 %v116_v45, %v113_v41 }
  0x75   :  { %v118_v47 = vadd.s32 %v117_v46, %v113_v41  ;;  %v119_v48 = vshll.u32 %v117_v46, 24  ;;  %v120_v49 = vshrl.u32 %v117_v46, 8 }
  0x77   :  { %v121_v50 = vor.u32 %v120_v49, %v119_v48  ;;  %v123_v52 = vadd.s32 %v118_v47, %v898_v1 }
  0x79   :  { %v122_v51 = vxor.u32 %v121_v50, %v118_v47 }
  0x7b   :  { %v124_v53 = vadd.s32 %v122_v51, %v902_v44 }
  0x7d   :  { %v125_v54 = vadd.s32 4, %v124_v53 }
  0x7f   :  { %v126_v55 = vadd.s32 %v125_v54, %v123_v52  ;;  %v127_v56 = vshll.u32 %v125_v54, 13  ;;  %v128_v57 = vshrl.u32 %v125_v54, 19 }
  0x81   :  { %v129_v58 = vor.u32 %v128_v57, %v127_v56 }
  0x83   :  { %v130_v59 = vxor.u32 %v129_v58, %v126_v55 }
  0x85   :  { %v131_v60 = vadd.s32 %v130_v59, %v126_v55  ;;  %v132_v61 = vshll.u32 %v130_v59, 15  ;;  %v133_v62 = vshrl.u32 %v130_v59, 17 }
  0x87   :  { %v134_v63 = vor.u32 %v133_v62, %v132_v61 }
  0x89   :  { %v135_v0 = vxor.u32 %v134_v63, %v131_v60 }
  0x8b   :  { %v136_v2 = vadd.s32 %v135_v0, %v131_v60  ;;  %v137_v3 = vshll.u32 %v135_v0, 26  ;;  %v138_v4 = vshrl.u32 %v135_v0, 6 }
  0x8d   :  { %v139_v5 = vor.u32 %v138_v4, %v137_v3 }
  0x8f   :  { %v140_v6 = vxor.u32 %v139_v5, %v136_v2 }
  0x91   :  { %v141_v7 = vadd.s32 %v140_v6, %v136_v2  ;;  %v142_v1 = vshll.u32 %v140_v6, 6  ;;  %v143_v8 = vshrl.u32 %v140_v6, 26 }
  0x93   :  { %v144_v9 = vor.u32 %v143_v8, %v142_v1  ;;  %v146_v11 = vadd.s32 %v141_v7, %v902_v44 }
  0x95   :  { %v145_v10 = vxor.u32 %v144_v9, %v141_v7 }
  0x97   :  { %v148_v12 = vadd.s32 5, %v145_v10 }
  0x99   :  { %v149_v13 = vxor.u32 %v148_v12, %v146_v11 }
  0x9b   :  { %150 = set.rngseed %v149_v13 }
  0x9c   :  { %v193_v17 = vrng }
  0x9d   :  { %v194_v19 = vrng  ;;  %v201_v26 = vshrl.u32 %v193_v17, 9 }
  0x9e   :  { %v195_v21 = vrng  ;;  %v202_v30 = vshrl.u32 %v194_v19, 9 }
  0x9f   :  { %v196_v22 = vrng  ;;  %v209_v29 = vor.u32 1065353216, %v201_v26  ;;  %v203_v32 = vshrl.u32 %v195_v21, 9 }
  0xa0   :  { %v197_v44 = vrng  ;;  %v204_v33 = vshrl.u32 %v196_v22, 9  ;;  %v210_v38 = vor.u32 1065353216, %v202_v30 }
  0xa1   :  { %v198_v27 = vrng  ;;  %v205_v34 = vshrl.u32 %v197_v44, 9  ;;  %v733_v37 = vadd.f32 -1.0, %v209_v29  ;;  %v211_v40 = vor.u32 1065353216, %v203_v32 }
  0xa2   :  { %v199_v31 = vrng  ;;  %v206_v39 = vshrl.u32 %v198_v27, 9  ;;  %v212_v42 = vor.u32 1065353216, %v204_v33  ;;  %v734_v47 = vadd.f32 -1.0, %v210_v38 }
  0xa3   :  { %v200_v35 = vrng  ;;  %v207_v41 = vshrl.u32 %v199_v31, 9  ;;  %v213_v45 = vor.u32 1065353216, %v205_v34  ;;  %v233_v46 = vmul.f32 2.0, %v733_v37  ;;  %v735_v49 = vadd.f32 -1.0, %v211_v40 }
  0xa4   :  { %v208_v43 = vshrl.u32 %v200_v35, 9  ;;  %v214_v48 = vor.u32 1065353216, %v206_v39  ;;  %v736_v51 = vadd.f32 -1.0, %v212_v42  ;;  %v234_v55 = vmul.f32 2.0, %v734_v47 }
  0xa5   :  { %v215_v50 = vor.u32 1065353216, %v207_v41  ;;  %v737_v53 = vadd.f32 -1.0, %v213_v45  ;;  %v241_v54 = vadd.f32 -0.99999994, %v233_v46  ;;  %v235_v57 = vmul.f32 2.0, %v735_v49 }
  0xa6   :  { %v216_v52 = vor.u32 1065353216, %v208_v43  ;;  %v738_v56 = vadd.f32 -1.0, %v214_v48  ;;  %v236_v59 = vmul.f32 2.0, %v736_v51  ;;  %v242_v63 = vadd.f32 -0.99999994, %v234_v55 }
  0xa7   :  { %v176_v15 = vpop.xlane.xlu0 %175  ;;  %v739_v58 = vadd.f32 -1.0, %v215_v50  ;;  %v237_v61 = vmul.f32 2.0, %v737_v53  ;;  %v914_v62 = vmax.f32 %v241_v54, -0.99999994  ;;  %v243_v2 = vadd.f32 -0.99999994, %v235_v57 }
  0xa8   :  { %v177_v16 = vmul.f32 0.001953125, %v176_v15  ;;  %v740_v60 = vadd.f32 -1.0, %v216_v52  ;;  %v238_v0 = vmul.f32 2.0, %v738_v56  ;;  %v244_v4 = vadd.f32 -0.99999994, %v236_v59 }
  0xa9   :  { %v239_v3 = vmul.f32 2.0, %v739_v58  ;;  %v245_v6 = vadd.f32 -0.99999994, %v237_v61  ;;  %v257_v7 = vsub.f32 0.0, %v914_v62  ;;  %v917_v1 = vmax.f32 %v242_v63, -0.99999994 }
  0xaa   :  { %770 = vlog2.f32 %v177_v16  ;;  %v240_v5 = vmul.f32 2.0, %v740_v60  ;;  %v246_v8 = vadd.f32 -0.99999994, %v238_v0  ;;  %v919_v10 = vmax.f32 %v243_v2, -0.99999994 }
  0xab   :  { %v247_v11 = vadd.f32 -0.99999994, %v239_v3  ;;  %v921_v12 = vmax.f32 %v244_v4, -0.99999994  ;;  %v923_v14 = vmax.f32 %v245_v6, -0.99999994  ;;  %v265_v16 = vmul.f32 %v257_v7, %v914_v62 }
  0xac   :  { %v248_v13 = vadd.f32 -0.99999994, %v240_v5  ;;  %v258_v17 = vsub.f32 0.0, %v917_v1  ;;  %v259_v19 = vsub.f32 0.0, %v919_v10 }
  0xad   :  { %v260_v21 = vsub.f32 0.0, %v921_v12  ;;  %v276_v40 = vmul.f32 -0.5, %v265_v16  ;;  %v279_v48 = vand.u32 2147483647, %v265_v16 }
  0xae   :  { %v935_v22 = vmax.f32 %v248_v13, -0.99999994  ;;  %v266_v44 = vmul.f32 %v258_v17, %v917_v1  ;;  %v942_v26 = vmul.f32 %v259_v19, %v919_v10 }
  0xaf   :  { %v277_v43 = vadd.f32 1.0, %v276_v40  ;;  %vm978_vm2 = vcmp.lt.f32.partialorder %v279_v48, 0.0004427343 }
  0xb0   :  { %v264_v29 = vsub.f32 0.0, %v935_v22  ;;  %v282_v31 = vadd.f32 1.0, %v266_v44  ;;  %v291_v33 = vadd.f32 1.0, %v942_v26  ;;  %v285_v45 = vmul.f32 -0.5, %v266_v44 }
  0xb1   :  { %v288_v49 = vand.u32 2147483647, %v266_v44  ;;  %v294_v50 = vmul.f32 -0.5, %v942_v26  ;;  %v278_v51 = vmul.f32 %v277_v43, %v265_v16  ;;  %v297_v53 = vand.u32 2147483647, %v942_v26 }
  0xb2   :  { %v286_v52 = vadd.f32 1.0, %v285_v45 }
  0xb3   :  { %v295_v0 = vadd.f32 1.0, %v294_v50  ;;  %vm983_vm3 = vcmp.lt.f32.partialorder %v288_v49, 0.0004427343  ;;  %vm988_vm4 = vcmp.lt.f32.partialorder %v297_v53, 0.0004427343 }
  0xb7   :  { %v771_v18 = vpop.eup %770 }
  0xb8   :  { %v179_v20 = vmul.f32 0.6931472, %v771_v18  ;;  %v929_v18 = vmax.f32 %v246_v8, -0.99999994 }
  0xba   :  { %v180_v23 = vmul.f32 4.3429446, %v179_v20  ;;  %v932_v20 = vmax.f32 %v247_v11, -0.99999994 }
  0xbc   :  { %v181_v25 = vsub.f32 %v180_v23, %v159_v24  ;;  %v261_v23 = vsub.f32 0.0, %v923_v14  ;;  %v273_v24 = vadd.f32 1.0, %v265_v16  ;;  %v263_v27 = vsub.f32 0.0, %v932_v20 }
  0xbe   :  { %v182_v28 = vmul.f32 0.23025851, %v181_v25  ;;  %v262_v25 = vsub.f32 0.0, %v929_v18  ;;  %v950_v30 = vmul.f32 %v261_v23, %v923_v14  ;;  %v957_v34 = vmul.f32 %v263_v27, %v932_v20 }
  0xc0   :  { %v183_v36 = vmul.f32 1.442695, %v182_v28  ;;  %v946_v28 = vmul.f32 %v260_v21, %v921_v12  ;;  %v953_v32 = vmul.f32 %v262_v25, %v929_v18  ;;  %v309_v37 = vadd.f32 1.0, %v950_v30 }
  0xc1   :  { %v327_v39 = vadd.f32 1.0, %v957_v34  ;;  %v312_v56 = vmul.f32 -0.5, %v950_v30  ;;  %v330_v2 = vmul.f32 -0.5, %v957_v34  ;;  %v315_v21 = vand.u32 2147483647, %v950_v30 }
  0xc2   :  { %772 = vpow2.f32 %v183_v36  ;;  %v300_v35 = vadd.f32 1.0, %v946_v28  ;;  %v961_v36 = vmul.f32 %v264_v29, %v935_v22  ;;  %v318_v38 = vadd.f32 1.0, %v953_v32 }
  0xc3   :  { %v303_v54 = vmul.f32 -0.5, %v946_v28  ;;  %v306_v55 = vand.u32 2147483647, %v946_v28  ;;  %v321_v59 = vmul.f32 -0.5, %v953_v32  ;;  %v324_v27 = vand.u32 2147483647, %v953_v32 }
  0xc4   :  { %v336_v41 = vadd.f32 1.0, %v961_v36  ;;  %v339_v7 = vmul.f32 -0.5, %v961_v36  ;;  %v331_v29 = vadd.f32 1.0, %v330_v2  ;;  %v342_v43 = vand.u32 2147483647, %v961_v36 }
  0xc5   :  { %v304_v6 = vadd.f32 1.0, %v303_v54  ;;  %vm992_vm5 = vcmp.lt.f32.partialorder %v306_v55, 0.0004427343  ;;  %v322_v23 = vadd.f32 1.0, %v321_v59  ;;  %vm1009_vm6 = vcmp.lt.f32.partialorder %v315_v21, 0.0004427343 }
  0xc6   :  { %vm1016_vm7 = vcmp.lt.f32.partialorder %v324_v27, 0.0004427343  ;;  %v332_v49 = vmul.f32 %v331_v29, %v957_v34  ;;  %vm343_vm9 = vcmp.lt.f32.partialorder %v342_v43, 0.0004427343 }
  0xcf   :  { %v773_v9 = vpop.eup %772 }
  0xd0   :  { %v925_v15 = vmul.f32 0.5, %v773_v9  ;;  %v287_v9 = vmul.f32 %v286_v52, %v266_v44  ;;  %v296_v44 = vmul.f32 %v295_v0, %v942_v26 }
  0xd2   :  { %774 = vrsqrt.f32 %v925_v15  ;;  %vm188_vm0 = vcmp.eq.f32.partialorder %v925_v15, inf  ;;  %v191_v57 = vand.u32 2147483648, %v925_v15  ;;  %vm190_vm1 = vcmp.eq.f32.partialorder %v925_v15, 0.0 }
  0xd3   :  { %776 = vlog2.f32 %v273_v24 }
  0xd4   :  { %778 = vlog2.f32 %v282_v31 }
  0xd5   :  { %780 = vlog2.f32 %v291_v33 }
  0xd6   :  { %782 = vlog2.f32 %v300_v35  ;;  %v305_v35 = vmul.f32 %v304_v6, %v946_v28  ;;  %v323_v28 = vmul.f32 %v322_v23, %v953_v32 }
  0xd7   :  { %784 = vlog2.f32 %v309_v37  ;;  %v333_v37 = vand.u32 2147483647, %v957_v34 }
  0xd8   :  { %786 = vlog2.f32 %v318_v38  ;;  %v340_v38 = vadd.f32 1.0, %v339_v7 }
  0xd9   :  { %788 = vlog2.f32 %v327_v39  ;;  %vm1023_vm8 = vcmp.lt.f32.partialorder %v333_v37, 0.0004427343 }
  0xda   :  { %790 = vlog2.f32 %v336_v41  ;;  %v341_v32 = vmul.f32 %v340_v38, %v961_v36 }
  0xdf   :  { %v775_v42 = vpop.eup %774 }
  0xe0   :  { %v187_v46 = vmul.f32 %v775_v42, %v925_v15  ;;  %v777_v47 = vpop.eup %776 }
  0xe1   :  { %v275_v58 = vmul.f32 0.6931472, %v777_v47  ;;  %v779_v61 = vpop.eup %778 }
  0xe2   :  { %v189_v60 = vsel %vm188_vm0, %v925_v15, %v187_v46  ;;  %v781_v4 = vpop.eup %780  ;;  %v313_v15 = vadd.f32 1.0, %v312_v56  ;;  %v284_v19 = vmul.f32 0.6931472, %v779_v61 }
  0xe3   :  { %v192_v3 = vsel %vm190_vm1, %v191_v57, %v189_v60  ;;  %v783_v8 = vpop.eup %782  ;;  %v281_v17 = vsel %vm978_vm2, %v278_v51, %v275_v58  ;;  %v293_v25 = vmul.f32 0.6931472, %v781_v4 }
  0xe4   :  { %691 = vperm.xlu0 %769, %v192_v3   ;;  %v785_v16 = vpop.eup %784  ;;  %v302_v33 = vmul.f32 0.6931472, %v783_v8  ;;  %v1003_v40 = vsub.f32 0.0, %v281_v17  ;;  %v314_v42 = vmul.f32 %v313_v15, %v950_v30  ;;  %v290_v26 = vsel %vm983_vm3, %v287_v9, %v284_v19 }
  0xe5   :  { %v787_v24 = vpop.eup %786  ;;  %v311_v41 = vmul.f32 0.6931472, %v785_v16  ;;  %v299_v47 = vsel %vm988_vm4, %v296_v44, %v293_v25  ;;  %v1028_v53 = vsub.f32 0.0, %v290_v26  ;;  %v862_v8 = vmov -0.00020021426  }
  0xe6   :  { %v789_v31 = vpop.eup %788  ;;  %v320_v46 = vmul.f32 0.6931472, %v787_v24  ;;  %v308_v50 = vsel %vm992_vm5, %v305_v35, %v302_v33  ;;  %792 = vrsqrt.f32 %v1003_v40  ;;  %v1033_v55 = vsub.f32 0.0, %v299_v47 }
  0xe7   :  { %v791_v39 = vpop.eup %790  ;;  %v329_v30 = vmul.f32 0.6931472, %v789_v31  ;;  %v317_v54 = vsel %vm1009_vm6, %v314_v42, %v311_v41  ;;  %v1037_v56 = vsub.f32 0.0, %v308_v50  ;;  %794 = vrsqrt.f32 %v1028_v53 }
  0xe8   :  { %v338_v52 = vmul.f32 0.6931472, %v791_v39  ;;  %v326_v34 = vsel %vm1016_vm7, %v323_v28, %v320_v46  ;;  %v1041_v58 = vsub.f32 0.0, %v317_v54  ;;  %796 = vrsqrt.f32 %v1033_v55 }
  0xe9   :  { %v335_v57 = vsel %vm1023_vm8, %v332_v49, %v329_v30  ;;  %v1044_v59 = vsub.f32 0.0, %v326_v34  ;;  %798 = vrsqrt.f32 %v1037_v56  ;;  %vm353_vm10 = vcmp.lt.f32.partialorder %v1003_v40, 5.0 }
  0xea   :  { %v344_v36 = vsel %vm343_vm9, %v341_v32, %v338_v52  ;;  %v1047_v60 = vsub.f32 0.0, %v335_v57  ;;  %800 = vrsqrt.f32 %v1041_v58  ;;  %vm371_vm11 = vcmp.eq.f32.partialorder %v1003_v40, inf }
  0xeb   :  { %v1050_v61 = vsub.f32 0.0, %v344_v36  ;;  %802 = vrsqrt.f32 %v1044_v59  ;;  %vm354_vm12 = vcmp.lt.f32.partialorder %v1028_v53, 5.0  ;;  %v1061_v6 = vadd.f32 -2.5, %v1003_v40 }
  0xec   :  { %804 = vrsqrt.f32 %v1047_v60  ;;  %vm373_vm13 = vcmp.eq.f32.partialorder %v1003_v40, 0.0  ;;  %v374_v7 = vand.u32 2147483648, %v1003_v40  ;;  %v1068_v9 = vsel %vm353_vm10, 2.8102264e-08, %v862_v8 }
  0xed   :  { %806 = vrsqrt.f32 %v1050_v61  ;;  %v863_v15 = vmov 0.00010095056   ;;  %v1077_v17 = vadd.f32 -2.5, %v1028_v53  ;;  %vm378_vm14 = vcmp.eq.f32.partialorder %v1028_v53, inf }
  0xee   :  { %v1074_v16 = vsel %vm353_vm10, 3.4327394e-07, %v863_v15  ;;  %vm380_vm15 = vcmp.eq.f32.partialorder %v1028_v53, 0.0  ;;  %v381_v23 = vand.u32 2147483648, %v1028_v53  ;;  %v1086_v24 = vsel %vm354_vm12, 2.8102264e-08, %v862_v8 }
  0xef   :  { %vm385_vm0 = vcmp.eq.f32.partialorder %v1033_v55, inf  ;;  %vm387_vm1 = vcmp.eq.f32.partialorder %v1033_v55, 0.0  ;;  %v388_v27 = vand.u32 2147483648, %v1033_v55  ;;  %vm392_vm2 = vcmp.eq.f32.partialorder %v1037_v56, inf }
  0xf0   :  { %vm394_vm3 = vcmp.eq.f32.partialorder %v1037_v56, 0.0  ;;  %v395_v35 = vand.u32 2147483648, %v1037_v56  ;;  %vm355_vm4 = vcmp.lt.f32.partialorder %v1033_v55, 5.0  ;;  %vm399_vm5 = vcmp.eq.f32.partialorder %v1041_v58, inf }
  0xf1   :  { %vm406_vm6 = vcmp.eq.f32.partialorder %v1044_v59, inf  ;;  %vm401_vm7 = vcmp.eq.f32.partialorder %v1041_v58, 0.0  ;;  %vm413_vm8 = vcmp.eq.f32.partialorder %v1047_v60, inf  ;;  %vm420_vm9 = vcmp.eq.f32.partialorder %v1050_v61, inf }
  0xf2   :  { %v402_v26 = vand.u32 2147483648, %v1041_v58  ;;  %v409_v45 = vand.u32 2147483648, %v1044_v59  ;;  %v416_v47 = vand.u32 2147483648, %v1047_v60  ;;  %v423_v48 = vand.u32 2147483648, %v1050_v61 }
  0xf3   :  { %v793_v63 = vpop.eup %792  ;;  %v743_v51 = vadd.f32 -2.5, %v1033_v55  ;;  %v744_v32 = vadd.f32 -2.5, %v1037_v56 }
  0xf4   :  { %v795_v0 = vpop.eup %794  ;;  %v370_v2 = vmul.f32 %v793_v63, %v1003_v40 }
  0xf5   :  { %v797_v3 = vpop.eup %796  ;;  %v377_v19 = vmul.f32 %v795_v0, %v1028_v53 }
  0xf6   :  { %v799_v4 = vpop.eup %798  ;;  %v372_v13 = vsel %vm371_vm11, %v1003_v40, %v370_v2  ;;  %v384_v44 = vmul.f32 %v797_v3, %v1033_v55  ;;  %vm408_vm11 = vcmp.eq.f32.partialorder %v1044_v59, 0.0 }
  0xf7   :  { %v801_v5 = vpop.eup %800  ;;  %v375_v29 = vsel %vm373_vm13, %v374_v7, %v372_v13  ;;  %v391_v31 = vmul.f32 %v799_v4, %v1037_v56  ;;  %v379_v33 = vsel %vm378_vm14, %v1028_v53, %v377_v19  ;;  %vm415_vm13 = vcmp.eq.f32.partialorder %v1047_v60, 0.0 }
  0xf8   :  { %v803_v11 = vpop.eup %802  ;;  %v398_v37 = vmul.f32 %v801_v5, %v1041_v58  ;;  %v386_v42 = vsel %vm385_vm0, %v1033_v55, %v384_v44  ;;  %vm422_vm14 = vcmp.eq.f32.partialorder %v1050_v61, 0.0  ;;  %v382_v50 = vsel %vm380_vm15, %v381_v23, %v379_v33 }
  0xf9   :  { %v805_v21 = vpop.eup %804  ;;  %v405_v38 = vmul.f32 %v803_v11, %v1044_v59  ;;  %v393_v43 = vsel %vm392_vm2, %v1037_v56, %v391_v31  ;;  %v389_v52 = vsel %vm387_vm1, %v388_v27, %v386_v42  ;;  %vm356_vm0 = vcmp.lt.f32.partialorder %v1037_v56, 5.0 }
  0xfa   :  { %v807_v25 = vpop.eup %806  ;;  %v412_v39 = vmul.f32 %v805_v21, %v1047_v60  ;;  %v400_v46 = vsel %vm399_vm5, %v1041_v58, %v398_v37  ;;  %v396_v54 = vsel %vm394_vm3, %v395_v35, %v393_v43  ;;  %v749_v36 = vadd.f32 -3.0, %v375_v29 }
  0xfb   :  { %v419_v41 = vmul.f32 %v807_v25, %v1050_v61  ;;  %v407_v28 = vsel %vm406_vm6, %v1044_v59, %v405_v38  ;;  %v403_v34 = vsel %vm401_vm7, %v402_v26, %v400_v46  ;;  %vm357_vm15 = vcmp.lt.f32.partialorder %v1041_v58, 5.0 }
  0xfc   :  { %v414_v30 = vsel %vm413_vm8, %v1047_v60, %v412_v39  ;;  %v410_v57 = vsel %vm408_vm11, %v409_v45, %v407_v28  ;;  %v750_v2 = vadd.f32 -3.0, %v382_v50  ;;  %v751_v3 = vadd.f32 -3.0, %v389_v52 }
  0xfd   :  { %v421_v49 = vsel %vm420_vm9, %v1050_v61, %v419_v41  ;;  %v417_v63 = vsel %vm415_vm13, %v416_v47, %v414_v30  ;;  %v745_v4 = vadd.f32 -2.5, %v1041_v58  ;;  %vm358_vm1 = vcmp.lt.f32.partialorder %v1044_v59, 5.0 }
  0xfe   :  { %v424_v0 = vsel %vm422_vm14, %v423_v48, %v421_v49  ;;  %v752_v5 = vadd.f32 -3.0, %v396_v54  ;;  %v753_v7 = vadd.f32 -3.0, %v403_v34  ;;  %v746_v11 = vadd.f32 -2.5, %v1044_v59 }
  0xff   :  { %v754_v13 = vadd.f32 -3.0, %v410_v57  ;;  %v747_v19 = vadd.f32 -2.5, %v1047_v60  ;;  %v755_v21 = vadd.f32 -3.0, %v417_v63  ;;  %v748_v23 = vadd.f32 -2.5, %v1050_v61 }
 0x100   :  { %v756_v25 = vadd.f32 -3.0, %v424_v0  ;;  %v443_v44 = vsel %vm355_vm4, 2.8102264e-08, %v862_v8  ;;  %v444_v27 = vsel %vm356_vm0, 2.8102264e-08, %v862_v8  ;;  %vm359_vm2 = vcmp.lt.f32.partialorder %v1047_v60, 5.0 }
 0x101   :  { %vm360_vm3 = vcmp.lt.f32.partialorder %v1050_v61, 5.0  ;;  %v1154_v29 = vsel %vm353_vm10, %v1061_v6, %v749_v36  ;;  %v1159_v31 = vsel %vm354_vm12, %v1077_v17, %v750_v2  ;;  %v1163_v33 = vsel %vm355_vm4, %v743_v51, %v751_v3 }
 0x102   :  { %v445_v35 = vsel %vm357_vm15, 2.8102264e-08, %v862_v8  ;;  %v1170_v37 = vsel %vm356_vm0, %v744_v32, %v752_v5  ;;  %v1174_v6 = vsel %vm357_vm15, %v745_v4, %v753_v7  ;;  %v1178_v17 = vsel %vm358_vm1, %v746_v11, %v754_v13 }
 0x103   :  { %v446_v38 = vsel %vm358_vm1, 2.8102264e-08, %v862_v8  ;;  %v1185_v39 = vsel %vm359_vm2, %v747_v19, %v755_v21  ;;  %v447_v41 = vsel %vm359_vm2, 2.8102264e-08, %v862_v8  ;;  %v1192_v42 = vsel %vm360_vm3, %v748_v23, %v756_v25 }
 0x104   :  { %v448_v43 = vsel %vm360_vm3, 2.8102264e-08, %v862_v8  ;;  %v457_v26 = vmul.f32 %v1068_v9, %v1154_v29  ;;  %v450_v45 = vsel %vm354_vm12, 3.4327394e-07, %v863_v15  ;;  %v458_v46 = vmul.f32 %v1086_v24, %v1159_v31 }
 0x105   :  { %v451_v28 = vsel %vm355_vm4, 3.4327394e-07, %v863_v15  ;;  %v459_v47 = vmul.f32 %v443_v44, %v1163_v33  ;;  %v452_v8 = vsel %vm356_vm0, 3.4327394e-07, %v863_v15  ;;  %v460_v48 = vmul.f32 %v444_v27, %v1170_v37 }
 0x106   :  { %v461_v9 = vmul.f32 %v445_v35, %v1174_v6  ;;  %v453_v30 = vsel %vm357_vm15, 3.4327394e-07, %v863_v15  ;;  %v462_v24 = vmul.f32 %v446_v38, %v1178_v17  ;;  %v463_v49 = vmul.f32 %v447_v41, %v1185_v39 }
 0x107   :  { %v464_v50 = vmul.f32 %v448_v43, %v1192_v42  ;;  %v454_v51 = vsel %vm358_vm1, 3.4327394e-07, %v863_v15  ;;  %v455_v52 = vsel %vm359_vm2, 3.4327394e-07, %v863_v15  ;;  %v456_v32 = vsel %vm360_vm3, 3.4327394e-07, %v863_v15 }
 0x108   :  { %v465_v54 = vadd.f32 %v457_v26, %v1074_v16  ;;  %v466_v34 = vadd.f32 %v458_v46, %v450_v45  ;;  %v467_v57 = vadd.f32 %v459_v47, %v451_v28  ;;  %v468_v36 = vadd.f32 %v460_v48, %v452_v8 }
 0x109   :  { %v469_v63 = vadd.f32 %v461_v9, %v453_v30  ;;  %v470_v0 = vadd.f32 %v462_v24, %v454_v51  ;;  %v471_v2 = vadd.f32 %v463_v49, %v455_v52  ;;  %v472_v3 = vadd.f32 %v464_v50, %v456_v32 }
 0x10a   :  { %v864_v4 = vmov 0.0013493432   ;;  %v481_v7 = vmul.f32 %v465_v54, %v1154_v29  ;;  %v482_v15 = vmul.f32 %v466_v34, %v1159_v31  ;;  %v483_v13 = vmul.f32 %v467_v57, %v1163_v33 }
 0x10b   :  { %v473_v5 = vsel %vm353_vm10, -3.5233877e-06, %v864_v4  ;;  %v474_v11 = vsel %vm354_vm12, -3.5233877e-06, %v864_v4  ;;  %v475_v16 = vsel %vm355_vm4, -3.5233877e-06, %v864_v4  ;;  %v484_v21 = vmul.f32 %v468_v36, %v1170_v37 }
 0x10c   :  { %v476_v19 = vsel %vm356_vm0, -3.5233877e-06, %v864_v4  ;;  %v485_v23 = vmul.f32 %v469_v63, %v1174_v6  ;;  %v477_v25 = vsel %vm357_vm15, -3.5233877e-06, %v864_v4  ;;  %v486_v44 = vmul.f32 %v470_v0, %v1178_v17 }
 0x10d   :  { %v487_v27 = vmul.f32 %v471_v2, %v1185_v39  ;;  %v488_v35 = vmul.f32 %v472_v3, %v1192_v42  ;;  %v478_v38 = vsel %vm358_vm1, -3.5233877e-06, %v864_v4  ;;  %v479_v41 = vsel %vm359_vm2, -3.5233877e-06, %v864_v4 }
 0x10e   :  { %v480_v43 = vsel %vm360_vm3, -3.5233877e-06, %v864_v4  ;;  %v489_v26 = vadd.f32 %v481_v7, %v473_v5  ;;  %v490_v45 = vadd.f32 %v482_v15, %v474_v11  ;;  %v491_v46 = vadd.f32 %v483_v13, %v475_v16 }
 0x10f   :  { %v492_v28 = vadd.f32 %v484_v21, %v476_v19  ;;  %v493_v47 = vadd.f32 %v485_v23, %v477_v25  ;;  %v494_v8 = vadd.f32 %v486_v44, %v478_v38  ;;  %v495_v48 = vadd.f32 %v487_v27, %v479_v41 }
 0x110   :  { %v496_v9 = vadd.f32 %v488_v35, %v480_v43  ;;  %v865_v30 = vmov -0.0036734284   ;;  %v505_v49 = vmul.f32 %v489_v26, %v1154_v29  ;;  %v506_v51 = vmul.f32 %v490_v45, %v1159_v31 }
 0x111   :  { %v497_v24 = vsel %vm353_vm10, -4.3915065e-06, %v865_v30  ;;  %v498_v50 = vsel %vm354_vm12, -4.3915065e-06, %v865_v30  ;;  %v499_v52 = vsel %vm355_vm4, -4.3915065e-06, %v865_v30  ;;  %v507_v32 = vmul.f32 %v491_v46, %v1163_v33 }
 0x112   :  { %v500_v54 = vsel %vm356_vm0, -4.3915065e-06, %v865_v30  ;;  %v508_v34 = vmul.f32 %v492_v28, %v1170_v37  ;;  %v509_v57 = vmul.f32 %v493_v47, %v1174_v6  ;;  %v501_v36 = vsel %vm357_vm15, -4.3915065e-06, %v865_v30 }
 0x113   :  { %v510_v63 = vmul.f32 %v494_v8, %v1178_v17  ;;  %v511_v0 = vmul.f32 %v495_v48, %v1185_v39  ;;  %v512_v2 = vmul.f32 %v496_v9, %v1192_v42  ;;  %v502_v3 = vsel %vm358_vm1, -4.3915065e-06, %v865_v30 }
 0x114   :  { %v503_v4 = vsel %vm359_vm2, -4.3915065e-06, %v865_v30  ;;  %v504_v5 = vsel %vm360_vm3, -4.3915065e-06, %v865_v30  ;;  %v513_v7 = vadd.f32 %v505_v49, %v497_v24  ;;  %v514_v11 = vadd.f32 %v506_v51, %v498_v50 }
 0x115   :  { %v515_v15 = vadd.f32 %v507_v32, %v499_v52  ;;  %v516_v16 = vadd.f32 %v508_v34, %v500_v54  ;;  %v517_v13 = vadd.f32 %v509_v57, %v501_v36  ;;  %v518_v19 = vadd.f32 %v510_v63, %v502_v3 }
 0x116   :  { %v519_v21 = vadd.f32 %v511_v0, %v503_v4  ;;  %v520_v23 = vadd.f32 %v512_v2, %v504_v5  ;;  %v866_v25 = vmov 0.0057395077   ;;  %v529_v27 = vmul.f32 %v513_v7, %v1154_v29 }
 0x117   :  { %v521_v44 = vsel %vm353_vm10, 0.00021858087, %v866_v25  ;;  %v522_v35 = vsel %vm354_vm12, 0.00021858087, %v866_v25  ;;  %v530_v38 = vmul.f32 %v514_v11, %v1159_v31  ;;  %v523_v41 = vsel %vm355_vm4, 0.00021858087, %v866_v25 }
 0x118   :  { %v531_v43 = vmul.f32 %v515_v15, %v1163_v33  ;;  %v524_v26 = vsel %vm356_vm0, 0.00021858087, %v866_v25  ;;  %v532_v45 = vmul.f32 %v516_v16, %v1170_v37  ;;  %v533_v46 = vmul.f32 %v517_v13, %v1174_v6 }
 0x119   :  { %v525_v28 = vsel %vm357_vm15, 0.00021858087, %v866_v25  ;;  %v534_v47 = vmul.f32 %v518_v19, %v1178_v17  ;;  %v535_v8 = vmul.f32 %v519_v21, %v1185_v39  ;;  %v536_v48 = vmul.f32 %v520_v23, %v1192_v42 }
 0x11a   :  { %v526_v9 = vsel %vm358_vm1, 0.00021858087, %v866_v25  ;;  %v527_v30 = vsel %vm359_vm2, 0.00021858087, %v866_v25  ;;  %v528_v24 = vsel %vm360_vm3, 0.00021858087, %v866_v25  ;;  %v537_v49 = vadd.f32 %v529_v27, %v521_v44 }
 0x11b   :  { %v538_v50 = vadd.f32 %v530_v38, %v522_v35  ;;  %v539_v51 = vadd.f32 %v531_v43, %v523_v41  ;;  %v540_v52 = vadd.f32 %v532_v45, %v524_v26  ;;  %v541_v32 = vadd.f32 %v533_v46, %v525_v28 }
 0x11c   :  { %v542_v54 = vadd.f32 %v534_v47, %v526_v9  ;;  %v543_v34 = vadd.f32 %v535_v8, %v527_v30  ;;  %v544_v57 = vadd.f32 %v536_v48, %v528_v24  ;;  %v867_v36 = vmov -0.0076224613  }
 0x11d   :  { %v545_v63 = vsel %vm353_vm10, -0.001253725, %v867_v36  ;;  %v553_v0 = vmul.f32 %v537_v49, %v1154_v29  ;;  %v546_v2 = vsel %vm354_vm12, -0.001253725, %v867_v36  ;;  %v554_v3 = vmul.f32 %v538_v50, %v1159_v31 }
 0x11e   :  { %v547_v4 = vsel %vm355_vm4, -0.001253725, %v867_v36  ;;  %v555_v5 = vmul.f32 %v539_v51, %v1163_v33  ;;  %v548_v7 = vsel %vm356_vm0, -0.001253725, %v867_v36  ;;  %v556_v11 = vmul.f32 %v540_v52, %v1170_v37 }
 0x11f   :  { %v557_v15 = vmul.f32 %v541_v32, %v1174_v6  ;;  %v549_v16 = vsel %vm357_vm15, -0.001253725, %v867_v36  ;;  %v558_v13 = vmul.f32 %v542_v54, %v1178_v17  ;;  %v559_v19 = vmul.f32 %v543_v34, %v1185_v39 }
 0x120   :  { %v560_v21 = vmul.f32 %v544_v57, %v1192_v42  ;;  %v550_v23 = vsel %vm358_vm1, -0.001253725, %v867_v36  ;;  %v551_v25 = vsel %vm359_vm2, -0.001253725, %v867_v36  ;;  %v552_v44 = vsel %vm360_vm3, -0.001253725, %v867_v36 }
 0x121   :  { %v561_v27 = vadd.f32 %v553_v0, %v545_v63  ;;  %v562_v35 = vadd.f32 %v554_v3, %v546_v2  ;;  %v563_v38 = vadd.f32 %v555_v5, %v547_v4  ;;  %v564_v41 = vadd.f32 %v556_v11, %v548_v7 }
 0x122   :  { %v565_v43 = vadd.f32 %v557_v15, %v549_v16  ;;  %v566_v26 = vadd.f32 %v558_v13, %v550_v23  ;;  %v567_v45 = vadd.f32 %v559_v19, %v551_v25  ;;  %v568_v46 = vadd.f32 %v560_v21, %v552_v44 }
 0x123   :  { %v868_v28 = vmov 0.0094388705   ;;  %v577_v8 = vmul.f32 %v561_v27, %v1154_v29  ;;  %v578_v9 = vmul.f32 %v562_v35, %v1159_v31  ;;  %v579_v24 = vmul.f32 %v563_v38, %v1163_v33 }
 0x124   :  { %v569_v47 = vsel %vm353_vm10, -0.0041776816, %v868_v28  ;;  %v570_v48 = vsel %vm354_vm12, -0.0041776816, %v868_v28  ;;  %v571_v30 = vsel %vm355_vm4, -0.0041776816, %v868_v28  ;;  %v580_v50 = vmul.f32 %v564_v41, %v1170_v37 }
 0x125   :  { %v572_v49 = vsel %vm356_vm0, -0.0041776816, %v868_v28  ;;  %v581_v51 = vmul.f32 %v565_v43, %v1174_v6  ;;  %v573_v52 = vsel %vm357_vm15, -0.0041776816, %v868_v28  ;;  %v582_v32 = vmul.f32 %v566_v26, %v1178_v17 }
 0x126   :  { %v583_v54 = vmul.f32 %v567_v45, %v1185_v39  ;;  %v584_v34 = vmul.f32 %v568_v46, %v1192_v42  ;;  %v574_v57 = vsel %vm358_vm1, -0.0041776816, %v868_v28  ;;  %v575_v36 = vsel %vm359_vm2, -0.0041776816, %v868_v28 }
 0x127   :  { %v576_v63 = vsel %vm360_vm3, -0.0041776816, %v868_v28  ;;  %v585_v0 = vadd.f32 %v577_v8, %v569_v47  ;;  %v586_v2 = vadd.f32 %v578_v9, %v570_v48  ;;  %v587_v3 = vadd.f32 %v579_v24, %v571_v30 }
 0x128   :  { %v588_v4 = vadd.f32 %v580_v50, %v572_v49  ;;  %v589_v5 = vadd.f32 %v581_v51, %v573_v52  ;;  %v590_v7 = vadd.f32 %v582_v32, %v574_v57  ;;  %v591_v11 = vadd.f32 %v583_v54, %v575_v36 }
 0x129   :  { %v592_v15 = vadd.f32 %v584_v34, %v576_v63  ;;  %v869_v16 = vmov 1.001674   ;;  %v601_v19 = vmul.f32 %v585_v0, %v1154_v29  ;;  %v602_v23 = vmul.f32 %v586_v2, %v1159_v31 }
 0x12a   :  { %v593_v13 = vsel %vm353_vm10, 0.24664073, %v869_v16  ;;  %v594_v21 = vsel %vm354_vm12, 0.24664073, %v869_v16  ;;  %v595_v25 = vsel %vm355_vm4, 0.24664073, %v869_v16  ;;  %v603_v44 = vmul.f32 %v587_v3, %v1163_v33 }
 0x12b   :  { %v596_v27 = vsel %vm356_vm0, 0.24664073, %v869_v16  ;;  %v604_v35 = vmul.f32 %v588_v4, %v1170_v37  ;;  %v605_v38 = vmul.f32 %v589_v5, %v1174_v6  ;;  %v597_v41 = vsel %vm357_vm15, 0.24664073, %v869_v16 }
 0x12c   :  { %v606_v43 = vmul.f32 %v590_v7, %v1178_v17  ;;  %v607_v26 = vmul.f32 %v591_v11, %v1185_v39  ;;  %v608_v45 = vmul.f32 %v592_v15, %v1192_v42  ;;  %v598_v46 = vsel %vm358_vm1, 0.24664073, %v869_v16 }
 0x12d   :  { %v599_v28 = vsel %vm359_vm2, 0.24664073, %v869_v16  ;;  %v600_v47 = vsel %vm360_vm3, 0.24664073, %v869_v16  ;;  %v609_v8 = vadd.f32 %v601_v19, %v593_v13  ;;  %v641_v48 = vand.u32 2147483647, %v914_v62 }
 0x12e   :  { %v1375_v9 = vmul.f32 inf, %v914_v62  ;;  %v610_v30 = vadd.f32 %v602_v23, %v594_v21  ;;  %v642_v24 = vand.u32 2147483647, %v917_v1  ;;  %v611_v49 = vadd.f32 %v603_v44, %v595_v25 }
 0x12f   :  { %v612_v50 = vadd.f32 %v604_v35, %v596_v27  ;;  %v613_v51 = vadd.f32 %v605_v38, %v597_v41  ;;  %v643_v52 = vand.u32 2147483647, %v919_v10  ;;  %v614_v32 = vadd.f32 %v606_v43, %v598_v46 }
 0x130   :  { %v615_v54 = vadd.f32 %v607_v26, %v599_v28  ;;  %v616_v34 = vadd.f32 %v608_v45, %v600_v47  ;;  %v870_v57 = vmov 2.8329768   ;;  %v658_v63 = vmul.f32 inf, %v917_v1 }
 0x131   :  { %v617_v36 = vsel %vm353_vm10, 1.5014094, %v870_v57  ;;  %v659_v0 = vmul.f32 inf, %v919_v10  ;;  %v644_v2 = vand.u32 2147483647, %v921_v12  ;;  %v625_v3 = vmul.f32 %v609_v8, %v1154_v29 }
 0x132   :  { %v618_v4 = vsel %vm354_vm12, 1.5014094, %v870_v57  ;;  %v626_v5 = vmul.f32 %v610_v30, %v1159_v31  ;;  %v619_v7 = vsel %vm355_vm4, 1.5014094, %v870_v57  ;;  %vm1390_vm5 = vcmp.eq.f32.partialorder %v641_v48, 1.0 }
 0x133   :  { %vm1394_vm10 = vcmp.eq.f32.partialorder %v642_v24, 1.0  ;;  %v627_v15 = vmul.f32 %v611_v49, %v1163_v33  ;;  %v620_v29 = vsel %vm356_vm0, 1.5014094, %v870_v57  ;;  %v628_v53 = vmul.f32 %v612_v50, %v1170_v37 }
 0x134   :  { %v629_v31 = vmul.f32 %v613_v51, %v1174_v6  ;;  %vm1403_vm12 = vcmp.eq.f32.partialorder %v643_v52, 1.0  ;;  %v621_v16 = vsel %vm357_vm15, 1.5014094, %v870_v57  ;;  %v630_v13 = vmul.f32 %v614_v32, %v1178_v17 }
 0x135   :  { %v631_v19 = vmul.f32 %v615_v54, %v1185_v39  ;;  %v632_v33 = vmul.f32 %v616_v34, %v1192_v42  ;;  %v622_v56 = vsel %vm358_vm1, 1.5014094, %v870_v57  ;;  %v623_v37 = vsel %vm359_vm2, 1.5014094, %v870_v57 }
 0x136   :  { %v624_v6 = vsel %vm360_vm3, 1.5014094, %v870_v57  ;;  %v633_v21 = vadd.f32 %v625_v3, %v617_v36  ;;  %v634_v23 = vadd.f32 %v626_v5, %v618_v4  ;;  %v660_v58 = vmul.f32 inf, %v921_v12 }
 0x137   :  { %v645_v25 = vand.u32 2147483647, %v923_v14  ;;  %v635_v17 = vadd.f32 %v627_v15, %v619_v7  ;;  %v636_v44 = vadd.f32 %v628_v53, %v620_v29  ;;  %vm1420_vm4 = vcmp.eq.f32.partialorder %v644_v2, 1.0 }
 0x138   :  { %v637_v59 = vadd.f32 %v629_v31, %v621_v16  ;;  %v661_v42 = vmul.f32 inf, %v923_v14  ;;  %v638_v60 = vadd.f32 %v630_v13, %v622_v56  ;;  %v639_v27 = vadd.f32 %v631_v19, %v623_v37  ;;  %v808_v31 = vld [vmem:[#allocation4] sm:$0xff]  ;;  %v809_v16 = vld [vmem:[#allocation4 + $0x8] sm:$0xff]  ;;  %v810_v19 = vld [vmem:[#allocation4 + $0x10] sm:$0xff] }
 0x139   :  { %v640_v35 = vadd.f32 %v632_v33, %v624_v6  ;;  %v646_v61 = vand.u32 2147483647, %v929_v18  ;;  %v647_v38 = vand.u32 2147483647, %v932_v20  ;;  %v648_v41 = vand.u32 2147483647, %v935_v22 }
 0x13a   :  { %v665_v43 = vmul.f32 %v633_v21, %v914_v62  ;;  %v666_v26 = vmul.f32 %v634_v23, %v917_v1  ;;  %vm1430_vm6 = vcmp.eq.f32.partialorder %v645_v25, 1.0  ;;  %v662_v46 = vmul.f32 inf, %v929_v18  ;;  %v811_v56 = vld [vmem:[#allocation4 + $0x18] sm:$0xff]  ;;  %v812_v6 = vld [vmem:[#allocation4 + $0x20] sm:$0xff]  ;;  %v813_v23 = vld [vmem:[#allocation4 + $0x28] sm:$0xff] }
 0x13b   :  { %v667_v28 = vmul.f32 %v635_v17, %v919_v10  ;;  %v668_v47 = vmul.f32 %v636_v44, %v921_v12  ;;  %v669_v8 = vmul.f32 %v637_v59, %v923_v14  ;;  %v663_v48 = vmul.f32 inf, %v932_v20  ;;  %v814_v25 = vld [vmem:[#allocation4 + $0x30] sm:$0xff]  ;;  %v815_v44 = vld [vmem:[#allocation4 + $0x38] sm:$0xff] }
 0x13c   :  { %v670_v30 = vmul.f32 %v638_v60, %v929_v18  ;;  %v671_v62 = vmul.f32 %v639_v27, %v932_v20  ;;  %v664_v1 = vmul.f32 inf, %v935_v22  ;;  %v672_v24 = vmul.f32 %v640_v35, %v935_v22 }
 0x13d   :  { %vm1443_vm7 = vcmp.eq.f32.partialorder %v646_v61, 1.0  ;;  %vm1447_vm8 = vcmp.eq.f32.partialorder %v647_v38, 1.0  ;;  %vm1451_vm9 = vcmp.eq.f32.partialorder %v648_v41, 1.0  ;;  %v673_v14 = vsel %vm1390_vm5, %v1375_v9, %v665_v43 }
 0x13e   :  { %v674_v18 = vsel %vm1394_vm10, %v658_v63, %v666_v26  ;;  %v675_v20 = vsel %vm1403_vm12, %v659_v0, %v667_v28  ;;  %v676_v22 = vsel %vm1420_vm4, %v660_v58, %v668_v47  ;;  %v677_v50 = vsel %vm1430_vm6, %v661_v42, %v669_v8 }
 0x13f   :  { %v680_v51 = vsel %vm1451_vm9, %v664_v1, %v672_v24  ;;  %v678_v52 = vsel %vm1443_vm7, %v662_v46, %v670_v30  ;;  %v679_v9 = vsel %vm1447_vm8, %v663_v48, %v671_v62  ;;  %v681_v32 = vmul.f32 1.4142135, %v673_v14 }
 0x140   :  { %v682_v54 = vmul.f32 1.4142135, %v674_v18  ;;  %v683_v34 = vmul.f32 1.4142135, %v675_v20  ;;  %v684_v57 = vmul.f32 1.4142135, %v676_v22 }
 0x141   :  { %v685_v36 = vmul.f32 1.4142135, %v677_v50  ;;  %v686_v63 = vmul.f32 1.4142135, %v678_v52  ;;  %v687_v0 = vmul.f32 1.4142135, %v679_v9 }
 0x142   :  { %v688_v2 = vmul.f32 1.4142135, %v680_v51 }
 0x15f   :  { %v692_v3 = vpop.permute.xlu0 %691 }
 0x160   :  { %v694_v4 = vmul.f32 %v692_v3, %v681_v32  ;;  %v695_v5 = vmul.f32 %v692_v3, %v682_v54  ;;  %v696_v7 = vmul.f32 %v692_v3, %v683_v34  ;;  %v697_v11 = vmul.f32 %v692_v3, %v684_v57 }
 0x161   :  { %v698_v40 = vmul.f32 %v692_v3, %v685_v36  ;;  %v699_v15 = vmul.f32 %v692_v3, %v686_v63  ;;  %v700_v29 = vmul.f32 %v692_v3, %v687_v0  ;;  %v701_v53 = vmul.f32 %v692_v3, %v688_v2 }
 0x162   :  { %v702_v55 = vadd.f32 %v808_v31, %v694_v4  ;;  %v703_v13 = vadd.f32 %v809_v16, %v695_v5  ;;  %v704_v33 = vadd.f32 %v810_v19, %v696_v7  ;;  %v705_v37 = vadd.f32 %v811_v56, %v697_v11 }
 0x163   :  { %v706_v21 = vadd.f32 %v812_v6, %v698_v40  ;;  %v707_v58 = vadd.f32 %v813_v23, %v699_v15  ;;  %v708_v17 = vadd.f32 %v814_v25, %v700_v29  ;;  %v709_v39 = vadd.f32 %v815_v44, %v701_v53 }
 0x164   :  { %710 = vst [vmem:[#allocation7] sm:$0xff] %v702_v55  ;;  %711 = vst [vmem:[#allocation7 + $0x8] sm:$0xff] %v703_v13 }
 0x165   :  { %712 = vst [vmem:[#allocation7 + $0x10] sm:$0xff] %v704_v33  ;;  %713 = vst [vmem:[#allocation7 + $0x18] sm:$0xff] %v705_v37 }
 0x166   :  { %714 = vst [vmem:[#allocation7 + $0x20] sm:$0xff] %v706_v21  ;;  %715 = vst [vmem:[#allocation7 + $0x28] sm:$0xff] %v707_v58 }
 0x167   :  { %716 = vst [vmem:[#allocation7 + $0x30] sm:$0xff] %v708_v17  ;;  %717 = vst [vmem:[#allocation7 + $0x38] sm:$0xff] %v709_v39 }
 0x168   :  { %847 = shalt.err (!%p844_p9)
}
 0x169   :  { %727 = dma.vmem_to_hbm [thread:$0]  %s725_s19, 1024, %s1478_s3, [#allocation6]  }
 0x16a   :  { %858 = dma.done.wait [#allocation6], 1024  }
 0x16b   :  { %859 = vsyncadd [#allocation6], 4294966272 }
 0x16c   :  { %731 = vsyncpa [#allocation5], 1 }
 0x16d   :  { %732 = vsyncpa [#allocation6], 1 }

// kernel: tpu_custom_call.1
= control target key start
LH: loop header
LB: loop body
LE: loop exit
PB: predicated region body
PF: predicated region fallthrough
CT: control target
= control target key end

     0   :  { %8 = vsyncpa [#allocation3], 0  ;;  %s272_s0 = inlined_call_operand.hbm [shape: f32[8,1024], index: 0, kind: input, shape index: {}]   ;;  %s273_s1 = inlined_call_operand.hbm [shape: f32[8,1024], index: 1, kind: input, shape index: {}]   ;;  %s274_s2 = inlined_call_operand.vmem [shape: f32[8,1], index: 2, kind: input, shape index: {}]   ;;  %s275_s3 = inlined_call_operand.hbm [shape: f32[8,1024], index: 3, kind: output, shape index: {}]  }
   0x1   :  { %9 = vsyncpa [#allocation6], 0 }
   0x2   :  { %10 = vsyncpa [#allocation4], 0  ;;  %s211_s12 = smov [#allocation2]   ;;  %s212_s14 = smov [#allocation5]  }
   0x3   :  { %s17_s13 = sshll.u32 %s211_s12, 4  ;;  %s27_s15 = sshll.u32 %s212_s14, 4  ;;  %s18_s13 = int_to_ptr.vmem [resolvable:$true] %s17_s13  ;;  %s28_s15 = int_to_ptr.vmem [resolvable:$true] %s27_s15 }
   0x4   :  { %s153_s16 = scalar_lea.vmem %s18_s13, 1024  ;;  %p158_p1 = scmp.lt.s32.totalorder %s18_s13, %s18_s13 }
   0x5   :  { %p154_p0 = scmp.ne.s32.totalorder %s18_s13, %s153_s16  ;;  %p159_p2 = scmp.lt.s32.totalorder %s153_s16, %s153_s16 }
   0x7   :  { %p160_p3 = por %p159_p2, %p158_p1 }
   0x9   :  { %p161_p4 = pnand %p160_p3, %p154_p0 }
   0xb   :  { %164 = shalt.err (!%p161_p4)
}
   0xc   :  { %20 = dma.hbm_to_vmem [thread:$0]  %s272_s0, 1024, %s18_s13, [#allocation3]  }
   0xd   :  { %s173_s19 = scalar_lea.vmem %s28_s15, 1024  ;;  %p178_p6 = scmp.lt.s32.totalorder %s28_s15, %s28_s15 }
   0xe   :  { %p174_p5 = scmp.ne.s32.totalorder %s28_s15, %s173_s19  ;;  %p179_p7 = scmp.lt.s32.totalorder %s173_s19, %s173_s19 }
  0x10   :  { %p180_p8 = por %p179_p7, %p178_p6 }
  0x12   :  { %p181_p9 = pnand %p180_p8, %p174_p5 }
  0x14   :  { %184 = shalt.err (!%p181_p9)
}
  0x15   :  { %30 = dma.hbm_to_vmem [thread:$0]  %s273_s1, 1024, %s28_s15, [#allocation6]  }
  0x16   :  { %205 = dma.done.wait [#allocation3], 1024  }
  0x17   :  { %206 = vsyncadd [#allocation3], 4294966272 }
  0x18   :  { %207 = dma.done.wait [#allocation6], 1024  }
  0x19   :  { %208 = vsyncadd [#allocation6], 4294966272  ;;  %v241_v0 = vld [vmem:[#allocation2] sm:$0xff]  ;;  %v243_v1 = vld [vmem:[#allocation2 + $0x8] sm:$0xff]  ;;  %v213_v23 = vmov 0  }
  0x1a   :  { %v245_v2 = vld [vmem:[#allocation2 + $0x10] sm:$0xff]  ;;  %v247_v3 = vld [vmem:[#allocation2 + $0x18] sm:$0xff]  ;;  %v48_v4 = vmul.f32 %v241_v0, %v241_v0  ;;  %v49_v5 = vmul.f32 %v243_v1, %v243_v1  ;;  %v255_v7 = vld [vmem:[#allocation2 + $0x20] sm:$0xff]  ;;  %138 = vset.pattern.permute.xlu0 %v213_v23 }
  0x1b   :  { %v50_v6 = vmul.f32 %v245_v2, %v245_v2  ;;  %v51_v8 = vmul.f32 %v247_v3, %v247_v3  ;;  %v44_v10 = vld [vmem:[#allocation2 + $0x28] sm:$0xff]  ;;  %v52_v11 = vmul.f32 %v255_v7, %v255_v7  ;;  %v45_v13 = vld [vmem:[#allocation2 + $0x30] sm:$0xff]  ;;  %v46_v16 = vld [vmem:[#allocation2 + $0x38] sm:$0xff] }
  0x1c   :  { %v56_v9 = vadd.f32 %v49_v5, %v48_v4  ;;  %v53_v14 = vmul.f32 %v44_v10, %v44_v10  ;;  %v54_v17 = vmul.f32 %v45_v13, %v45_v13  ;;  %v55_v19 = vmul.f32 %v46_v16, %v46_v16  ;;  %v47_v28 = vld [vmem:[%s274_s2] sm:$0xff]  ;;  %v82_v41 = vld [vmem:[#allocation5 + $0x8] sm:$0xff]  ;;  %v83_v42 = vld [vmem:[#allocation5 + $0x10] sm:$0xff]  ;;  %s214_s2 = smov [#allocation7]  }
  0x1d   :  { %v81_v40 = vld [vmem:[#allocation5] sm:$0xff]  ;;  %v84_v43 = vld [vmem:[#allocation5 + $0x18] sm:$0xff]  ;;  %v86_v45 = vld [vmem:[#allocation5 + $0x28] sm:$0xff]  ;;  %s124_s22 = sshll.u32 %s214_s2, 4  ;;  %s125_s22 = int_to_ptr.vmem [resolvable:$true] %s124_s22 }
  0x1e   :  { %v57_v12 = vadd.f32 %v56_v9, %v50_v6  ;;  %v85_v44 = vld [vmem:[#allocation5 + $0x20] sm:$0xff]  ;;  %v87_v46 = vld [vmem:[#allocation5 + $0x30] sm:$0xff]  ;;  %v88_v47 = vld [vmem:[#allocation5 + $0x38] sm:$0xff]  ;;  %s185_s23 = scalar_lea.vmem %s125_s22, 1024  ;;  %p190_p11 = scmp.lt.s32.totalorder %s125_s22, %s125_s22 }
  0x1f   :  { %p186_p10 = scmp.ne.s32.totalorder %s125_s22, %s185_s23  ;;  %p191_p12 = scmp.lt.s32.totalorder %s185_s23, %s185_s23 }
  0x20   :  { %v58_v15 = vadd.f32 %v57_v12, %v51_v8 }
  0x21   :  { %p192_p13 = por %p191_p12, %p190_p11 }
  0x22   :  { %v59_v18 = vadd.f32 %v58_v15, %v52_v11 }
  0x23   :  { %p193_p0 = pnand %p192_p13, %p186_p10 }
  0x24   :  { %v60_v20 = vadd.f32 %v59_v18, %v53_v14 }
  0x26   :  { %v61_v21 = vadd.f32 %v60_v20, %v54_v17 }
  0x28   :  { %v62_v22 = vadd.f32 %v61_v21, %v55_v19 }
  0x2a   :  { %63 = vadd.xlane.f32.xlu0 %v62_v22 }
  0xb3   :  { %v64_v24 = vpop.xlane.xlu0 %63 }
  0xb4   :  { %v65_v25 = vmul.f32 0.001953125, %v64_v24 }
  0xb6   :  { %139 = vlog2.f32 %v65_v25 }
  0xc3   :  { %v140_v26 = vpop.eup %139 }
  0xc4   :  { %v67_v27 = vmul.f32 0.6931472, %v140_v26 }
  0xc6   :  { %v68_v29 = vmul.f32 4.3429446, %v67_v27 }
  0xc8   :  { %v69_v30 = vsub.f32 %v68_v29, %v47_v28 }
  0xca   :  { %v70_v31 = vmul.f32 0.23025851, %v69_v30 }
  0xcc   :  { %v71_v32 = vmul.f32 1.442695, %v70_v31 }
  0xce   :  { %141 = vpow2.f32 %v71_v32 }
  0xdb   :  { %v142_v33 = vpop.eup %141 }
  0xdc   :  { %v73_v34 = vmul.f32 0.5, %v142_v33 }
  0xde   :  { %143 = vrsqrt.f32 %v73_v34  ;;  %vm76_vm0 = vcmp.eq.f32.partialorder %v73_v34, inf  ;;  %v79_v37 = vand.u32 2147483648, %v73_v34  ;;  %vm78_vm1 = vcmp.eq.f32.partialorder %v73_v34, 0.0 }
  0xeb   :  { %v144_v35 = vpop.eup %143 }
  0xec   :  { %v75_v36 = vmul.f32 %v144_v35, %v73_v34 }
  0xee   :  { %v77_v38 = vsel %vm76_vm0, %v73_v34, %v75_v36 }
  0xef   :  { %v80_v39 = vsel %vm78_vm1, %v79_v37, %v77_v38 }
  0xf0   :  { %91 = vperm.xlu0 %138, %v80_v39  }
 0x16b   :  { %v92_v48 = vpop.permute.xlu0 %91 }
 0x16c   :  { %v94_v49 = vmul.f32 %v92_v48, %v81_v40  ;;  %v95_v50 = vmul.f32 %v92_v48, %v82_v41  ;;  %v96_v51 = vmul.f32 %v92_v48, %v83_v42  ;;  %v97_v52 = vmul.f32 %v92_v48, %v84_v43 }
 0x16d   :  { %v98_v53 = vmul.f32 %v92_v48, %v85_v44  ;;  %v99_v54 = vmul.f32 %v92_v48, %v86_v45  ;;  %v100_v55 = vmul.f32 %v92_v48, %v87_v46  ;;  %v101_v56 = vmul.f32 %v92_v48, %v88_v47 }
 0x16e   :  { %v102_v57 = vadd.f32 %v94_v49, %v241_v0  ;;  %v103_v58 = vadd.f32 %v95_v50, %v243_v1  ;;  %v104_v59 = vadd.f32 %v96_v51, %v245_v2  ;;  %v105_v60 = vadd.f32 %v97_v52, %v247_v3 }
 0x16f   :  { %v106_v61 = vadd.f32 %v98_v53, %v255_v7  ;;  %v107_v62 = vadd.f32 %v99_v54, %v44_v10  ;;  %v108_v63 = vadd.f32 %v100_v55, %v45_v13  ;;  %v109_v4 = vadd.f32 %v101_v56, %v46_v16 }
 0x170   :  { %110 = vst [vmem:[#allocation7] sm:$0xff] %v102_v57  ;;  %111 = vst [vmem:[#allocation7 + $0x8] sm:$0xff] %v103_v58 }
 0x171   :  { %112 = vst [vmem:[#allocation7 + $0x10] sm:$0xff] %v104_v59  ;;  %113 = vst [vmem:[#allocation7 + $0x18] sm:$0xff] %v105_v60 }
 0x172   :  { %114 = vst [vmem:[#allocation7 + $0x20] sm:$0xff] %v106_v61  ;;  %115 = vst [vmem:[#allocation7 + $0x28] sm:$0xff] %v107_v62 }
 0x173   :  { %116 = vst [vmem:[#allocation7 + $0x30] sm:$0xff] %v108_v63  ;;  %117 = vst [vmem:[#allocation7 + $0x38] sm:$0xff] %v109_v4 }
 0x174   :  { %196 = shalt.err (!%p193_p0)
}
 0x175   :  { %127 = dma.vmem_to_hbm [thread:$0]  %s125_s22, 1024, %s275_s3, [#allocation4]  }
 0x176   :  { %209 = dma.done.wait [#allocation4], 1024  }
 0x177   :  { %210 = vsyncadd [#allocation4], 4294966272 }
 0x178   :  { %131 = vsyncpa [#allocation3], 1 }
 0x179   :  { %132 = vsyncpa [#allocation6], 1 }
 0x17a   :  { %133 = vsyncpa [#allocation4], 1 }

</bundles_post_ra>
